<compile_context>
chip_gen: v5e
topology: v5e:2x2
jax: 0.10.0
libtpu: 0.0.40
codegen_flags: <defaults>
</compile_context>

<pallas_src>
import functools

import numpy as np
import jax
import jax.numpy as jnp
from jax import lax
from jax.experimental import pallas as pl
from jax.experimental.pallas import tpu as pltpu


# --------------------------------------------------------------------------
# host-side constant builders (layout / parameter plumbing, done once at trace)
# --------------------------------------------------------------------------
def _pool_matrices(m):
    """Q_r / Q_c / Q_d (m*m, m):  x_flat @ Q_*  -> row sums / col sums / diagonal."""
    qr = np.zeros((m * m, m), np.float32)
    qc = np.zeros((m * m, m), np.float32)
    qd = np.zeros((m * m, m), np.float32)
    for i in range(m):
        for j in range(m):
            qr[i * m + j, i] = 1.0
            qc[i * m + j, j] = 1.0
        qd[i * m + i, i] = 1.0
    return qr, qc, qd


def _placement_matrix(m):
    """P_all (5m, m*m); row groups: [diag-face, row-bcast, col-bcast, diag-sum, all-sum]."""
    p = np.zeros((5 * m, m * m), np.float32)
    for i in range(m):
        p[i, i * m + i] = 1.0                 # v[i]   -> (i, i)
        p[m + i, i * m:(i + 1) * m] = 1.0     # v[i]   -> (i, :)
        p[2 * m + i, i::m] = 1.0              # v[j]   -> (:, j)
        p[3 * m:4 * m, i * m + i] = 1.0       # sum(v) -> every (i, i)
    p[4 * m:5 * m, :] = 1.0                   # sum(v) -> everywhere
    return p


def _transpose_matrix(m):
    """T_perm (m*m, m*m):  x_flat @ T_perm == (x^T)_flat."""
    t = np.zeros((m * m, m * m), np.float32)
    for i in range(m):
        for j in range(m):
            t[j * m + i, i * m + j] = 1.0
    return t


def _fold_layer(coefs, bias, diag_bias, nb):
    """Fold one Eq2to2 layer's coefs (D,S,15) + bias/diag_bias (S,) into the
    block-structured matrices the fused kernel consumes.

    Group order everywhere: [diag-face, row-bcast, col-bcast, diag-sum, all-sum].
      w_diag / w_row / w_col : (nb*D, 5*nb*S)  channel-mix of diag/row-sum/col-sum pools
      b_l                    : (5*nb*S, 1)     additive bias on the pooled values
      c_id / c_tr            : (nb*D, nb*S)    identity / transpose basis ops
    """
    D, S, B = coefs.shape
    assert B == 15, "expected the 15-element 2->2 equivariant basis"
    c = coefs
    eye_nb = jnp.eye(nb, dtype=c.dtype)

    def bd(mat):  # (D, S) -> per-element block-diagonal (nb*D, nb*S)
        return jnp.kron(eye_nb, mat)

    z = jnp.zeros((D, S), c.dtype)
    w_diag = jnp.concatenate([bd(c[:, :, 0]), bd(c[:, :, 11]), bd(c[:, :, 12]),
                              bd(c[:, :, 1]), bd(c[:, :, 13])], axis=1)
    w_row = jnp.concatenate([bd(c[:, :, 2]), bd(c[:, :, 6]), bd(c[:, :, 8]),
                             bd(c[:, :, 4]), bd(c[:, :, 14])], axis=1)
    w_col = jnp.concatenate([bd(c[:, :, 3]), bd(c[:, :, 5]), bd(c[:, :, 7]),
                             bd(z), bd(z)], axis=1)

    zs = jnp.zeros_like(bias)
    b_l = jnp.concatenate([jnp.tile(g, nb) for g in
                           (diag_bias, bias, zs, zs, zs)])[:, None]   # (5*nb*S, 1)

    c_id = bd(c[:, :, 9])
    c_tr = bd(c[:, :, 10])
    return w_diag, w_row, w_col, b_l, c_id, c_tr


def _fold_fc(fc_w, fc_b, nb, o_pad):
    """Fold nn.Linear(S, O) into a block-diagonal (nb*S, nb*o_pad) matrix + bias column."""
    o_dim, s = fc_w.shape
    w_t = jnp.zeros((s, o_pad), fc_w.dtype).at[:, :o_dim].set(fc_w.T)
    w_big = jnp.kron(jnp.eye(nb, dtype=fc_w.dtype), w_t)              # (nb*S, nb*o_pad)
    b = jnp.zeros((o_pad,), fc_b.dtype).at[:o_dim].set(fc_b)
    b_big = jnp.tile(b, nb)[:, None]                                  # (nb*o_pad, 1)
    return w_big, b_big


# --------------------------------------------------------------------------
# fused Net2to2 kernel: all Eq2to2 layers (+ReLU) + output Linear, per batch chunk
# --------------------------------------------------------------------------
def _net2to2_kernel(*refs, nb, m, dims, num_layers):
    # refs = [x, Q_r, Q_c, Q_d, T_perm, P_all] + 6 per layer + [fc_w, fc_b] + [out]
    x_ref = refs[0]
    qr = refs[1][...]
    qc = refs[2][...]
    qd = refs[3][...]
    t_perm = refs[4][...]
    p_all = refs[5][...]
    layer_refs = refs[6:6 + 6 * num_layers]
    fcw_ref = refs[6 + 6 * num_layers]
    fcb_ref = refs[7 + 6 * num_layers]
    o_ref = refs[-1]

    def dot_t(a, b):  # a^T @ b on the MXU with f32 accumulation
        return lax.dot_general(a, b, (((0,), (0,)), ((), ())),
                               preferred_element_type=jnp.float32)

    h = x_ref[...]                                                  # (nb*D0, m*m)
    for l in range(num_layers):                                     # static unroll over layers
        wd_ref, wr_ref, wc_ref, bl_ref, cid_ref, ctr_ref = layer_refs[6 * l:6 * l + 6]
        r = nb * dims[l + 1]                                        # rows per placement group

        # pooled features: row-sums / col-sums / diagonal (shared LHS, separate
        # outputs -> no lane-offset slicing of a combined feats buffer)
        f_row = jnp.dot(h, qr, preferred_element_type=jnp.float32)  # (nb*D, m)
        f_col = jnp.dot(h, qc, preferred_element_type=jnp.float32)
        f_dia = jnp.dot(h, qd, preferred_element_type=jnp.float32)

        # per-element channel mix -> group-major pooled values (5*nb*S, m);
        # both bias terms folded into the additive constant b_l
        pooled = (dot_t(wd_ref[...], f_dia) + dot_t(wr_ref[...], f_row)
                  + dot_t(wc_ref[...], f_col) + bl_ref[...])

        # identity + transpose basis ops (transpose realized on the MXU via T_perm)
        h_t = jnp.dot(h, t_perm, preferred_element_type=jnp.float32)   # (nb*D, m*m)
        out = dot_t(cid_ref[...], h) + dot_t(ctr_ref[...], h_t)        # (nb*S, m*m)

        # place the five pooled groups; all row slices are 8-sublane aligned and
        # every matmul writes the full lane-dense (m*m) face
        for g in range(5):
            out = out + jnp.dot(pooled[g * r:(g + 1) * r, :],
                                p_all[g * m:(g + 1) * m, :],
                                preferred_element_type=jnp.float32)

        h = jnp.maximum(out, 0.0)                                   # fused ReLU

    # fused output Linear (out channels padded to a multiple of 8 sublanes)
    y = dot_t(fcw_ref[...], h) + fcb_ref[...]                       # (nb*Op, m*m)
    o_ref[...] = y.astype(o_ref.dtype)


def net2to2_forward(params, x, *, nb=2):
    """x: (N, d, m, m) -> (N, m, m, out_dim), single fused pallas_call."""
    N, D0, m, _ = x.shape
    MM = m * m
    eq_layers = params["eq_layers"]
    num_layers = len(eq_layers)
    dims = [D0] + [c.shape[1] for (c, _, _) in eq_layers]
    o_dim = params["fc_w"].shape[0]
    o_pad = max(8, -(-o_dim // 8) * 8)

    assert N % nb == 0, "batch must be divisible by the chunk size nb"
    assert m % 8 == 0, "m must be a multiple of 8 (sublane alignment)"
    for s in dims[1:]:
        assert (nb * s) % 8 == 0, "nb * layer out_dim must be a multiple of 8"

    qr, qc, qd = (jnp.asarray(a) for a in _pool_matrices(m))
    t_perm = jnp.asarray(_transpose_matrix(m))
    p_all = jnp.asarray(_placement_matrix(m))

    layer_params = []
    for (coefs, bias, diag_bias) in eq_layers:
        layer_params.extend(_fold_layer(coefs, bias, diag_bias, nb))
    fcw, fcb = _fold_fc(params["fc_w"], params["fc_b"], nb, o_pad)

    # element-major rows (n*D0 + d); a block of nb*D0 rows == one batch chunk
    x_flat = x.reshape(N * D0, MM)

    def const_spec(arr):  # resident parameter: constant index_map, DMA'd once
        return pl.BlockSpec(arr.shape, lambda i: (0, 0))

    in_specs = ([pl.BlockSpec((nb * D0, MM), lambda i: (i, 0))]
                + [const_spec(a) for a in (qr, qc, qd, t_perm, p_all)]
                + [const_spec(a) for a in layer_params]
                + [const_spec(fcw), const_spec(fcb)])

    kernel = functools.partial(_net2to2_kernel, nb=nb, m=m,
                               dims=tuple(dims), num_layers=num_layers)
    y = pl.pallas_call(
        kernel,
        out_shape=jax.ShapeDtypeStruct((N * o_pad, MM), x.dtype),
        grid=(N // nb,),
        in_specs=in_specs,
        out_specs=pl.BlockSpec((nb * o_pad, MM), lambda i: (i, 0)),
        compiler_params=pltpu.CompilerParams(dimension_semantics=("parallel",)),
    )(x_flat, qr, qc, qd, t_perm, p_all, *layer_params, fcw, fcb)

    # un-pad out channels and restore the module's (N, m, m, out_dim) layout (once, cheap)
    return y.reshape(N, o_pad, m, m)[:, :o_dim].transpose(0, 2, 3, 1)


# --------------------------------------------------------------------------
# pure-JAX reference (straightforward ops-tensor implementation) for checking
# --------------------------------------------------------------------------
def _eops_2_to_2_ref(x):
    m = x.shape[-1]
    diag = jnp.diagonal(x, axis1=-2, axis2=-1)            # (N, D, m)
    sum_diag = jnp.sum(diag, axis=-1)                     # (N, D)
    row_sum = jnp.sum(x, axis=-1)                         # (N, D, m)
    col_sum = jnp.sum(x, axis=-2)                         # (N, D, m)
    tot = jnp.sum(x, axis=(-2, -1))                       # (N, D)
    eye = jnp.eye(m, dtype=x.dtype)

    def demb(v):
        return v[..., :, None] * eye

    o1 = demb(diag)
    o2 = demb(jnp.broadcast_to(sum_diag[..., None], diag.shape))
    o3 = demb(row_sum)
    o4 = demb(col_sum)
    o5 = demb(jnp.broadcast_to(tot[..., None], diag.shape))
    o6 = jnp.broadcast_to(col_sum[..., :, None], x.shape)
    o7 = jnp.broadcast_to(row_sum[..., :, None], x.shape)
    o8 = jnp.broadcast_to(col_sum[..., None, :], x.shape)
    o9 = jnp.broadcast_to(row_sum[..., None, :], x.shape)
    o10 = x
    o11 = jnp.swapaxes(x, -1, -2)
    o12 = jnp.broadcast_to(diag[..., :, None], x.shape)
    o13 = jnp.broadcast_to(diag[..., None, :], x.shape)
    o14 = jnp.broadcast_to(sum_diag[..., None, None], x.shape)
    o15 = jnp.broadcast_to(tot[..., None, None], x.shape)
    return jnp.stack([o1, o2, o3, o4, o5, o6, o7, o8, o9, o10, o11, o12, o13, o14, o15], axis=2)


def _eq2to2_ref(x, coefs, bias, diag_bias):
    ops = _eops_2_to_2_ref(x)                                             # (N, D, 15, m, m)
    out = jnp.einsum('dsb,ndbij->nsij', coefs, ops, precision="highest")  # (N, S, m, m)
    m = x.shape[-1]
    eye = jnp.eye(m, dtype=x.dtype)
    return out + bias[None, :, None, None] + eye * diag_bias[None, :, None, None]


def net2to2_ref(params, x):
    h = x
    for (coefs, bias, diag_bias) in params["eq_layers"]:
        h = jax.nn.relu(_eq2to2_ref(h, coefs, bias, diag_bias))
    h = jnp.transpose(h, (0, 2, 3, 1))
    return h @ params["fc_w"].T + params["fc_b"]


# --------------------------------------------------------------------------
if __name__ == "__main__":
    key = jax.random.PRNGKey(0)
    N, m = 8, 16
    layer_dims = [(4, 8), (8, 8)]   # (in_dim, out_dim) per Eq2to2 layer
    out_dim = 3
    nb = 2                          # chunk per grid step -> grid length 4 ("parallel")

    keys = jax.random.split(key, 3 * len(layer_dims) + 3)
    eq_layers = []
    for li, (din, dout) in enumerate(layer_dims):
        k1, k2, k3 = keys[3 * li], keys[3 * li + 1], keys[3 * li + 2]
        std = float(np.sqrt(2.0 / (din + dout + 15)))
        coefs = std * jax.random.normal(k1, (din, dout, 15), jnp.float32)
        # torch init is zeros; small non-zero values exercise the folded-bias path
        bias = 0.1 * jax.random.normal(k2, (dout,), jnp.float32)
        diag_bias = 0.1 * jax.random.normal(k3, (dout,), jnp.float32)
        eq_layers.append((coefs, bias, diag_bias))
    kx, kw, kb = keys[-3], keys[-2], keys[-1]
    s_last = layer_dims[-1][1]
    fc_w = jax.random.normal(kw, (out_dim, s_last), jnp.float32) / np.sqrt(s_last)
    fc_b = 0.01 * jax.random.normal(kb, (out_dim,), jnp.float32)
    params = {"eq_layers": eq_layers, "fc_w": fc_w, "fc_b": fc_b}

    x = jax.random.normal(kx, (N, layer_dims[0][0], m, m), jnp.float32)

    fwd = jax.jit(functools.partial(net2to2_forward, nb=nb))
    y = fwd(params, x)
    jax.block_until_ready(y)
    assert y.shape == (N, m, m, out_dim)

    # correctness check against a straightforward XLA implementation (tight, all-f32)
    y_ref = jax.jit(net2to2_ref)(params, x)
    jax.block_until_ready(y_ref)
    rel_err = float(jnp.max(jnp.abs(y - y_ref)) / (jnp.max(jnp.abs(y_ref)) + 1e-6))
    assert rel_err < 1e-4, f"kernel/reference mismatch: rel_err={rel_err}"

    print("KERNEL_OK")
</pallas_src>

<mosaic_0001>
module attributes {stable_mosaic.version = 11 : i64} {
  func.func @_net2to2_kernel(%arg0: i32, %arg1: memref<8x256xf32, #tpu.memory_space<vmem>>, %arg2: memref<256x16xf32, #tpu.memory_space<vmem>>, %arg3: memref<256x16xf32, #tpu.memory_space<vmem>>, %arg4: memref<256x16xf32, #tpu.memory_space<vmem>>, %arg5: memref<256x256xf32, #tpu.memory_space<vmem>>, %arg6: memref<80x256xf32, #tpu.memory_space<vmem>>, %arg7: memref<8x80xf32, #tpu.memory_space<vmem>>, %arg8: memref<8x80xf32, #tpu.memory_space<vmem>>, %arg9: memref<8x80xf32, #tpu.memory_space<vmem>>, %arg10: memref<80x1xf32, #tpu.memory_space<vmem>>, %arg11: memref<8x16xf32, #tpu.memory_space<vmem>>, %arg12: memref<8x16xf32, #tpu.memory_space<vmem>>, %arg13: memref<16x80xf32, #tpu.memory_space<vmem>>, %arg14: memref<16x80xf32, #tpu.memory_space<vmem>>, %arg15: memref<16x80xf32, #tpu.memory_space<vmem>>, %arg16: memref<80x1xf32, #tpu.memory_space<vmem>>, %arg17: memref<16x16xf32, #tpu.memory_space<vmem>>, %arg18: memref<16x16xf32, #tpu.memory_space<vmem>>, %arg19: memref<16x16xf32, #tpu.memory_space<vmem>>, %arg20: memref<16x1xf32, #tpu.memory_space<vmem>>, %arg21: memref<16x256xf32, #tpu.memory_space<vmem>>) attributes {dimension_semantics = [#tpu.dimension_semantics<parallel>], iteration_bounds = array<i64: 4>, scalar_prefetch = 0 : i64, scratch_operands = 0 : i64, tpu.core_type = #tpu.core_type<tc>, window_params = [{transform_indices = @transform_0, window_bounds = array<i64: 8, 256>}, {pipeline_mode = #tpu.pipeline_mode<synchronous>, transform_indices = @transform_1, window_bounds = array<i64: 256, 16>}, {pipeline_mode = #tpu.pipeline_mode<synchronous>, transform_indices = @transform_2, window_bounds = array<i64: 256, 16>}, {pipeline_mode = #tpu.pipeline_mode<synchronous>, transform_indices = @transform_3, window_bounds = array<i64: 256, 16>}, {pipeline_mode = #tpu.pipeline_mode<synchronous>, transform_indices = @transform_4, window_bounds = array<i64: 256, 256>}, {pipeline_mode = #tpu.pipeline_mode<synchronous>, transform_indices = @transform_5, window_bounds = array<i64: 80, 256>}, {pipeline_mode = #tpu.pipeline_mode<synchronous>, transform_indices = @transform_6, window_bounds = array<i64: 8, 80>}, {pipeline_mode = #tpu.pipeline_mode<synchronous>, transform_indices = @transform_7, window_bounds = array<i64: 8, 80>}, {pipeline_mode = #tpu.pipeline_mode<synchronous>, transform_indices = @transform_8, window_bounds = array<i64: 8, 80>}, {pipeline_mode = #tpu.pipeline_mode<synchronous>, transform_indices = @transform_9, window_bounds = array<i64: 80, 1>}, {pipeline_mode = #tpu.pipeline_mode<synchronous>, transform_indices = @transform_10, window_bounds = array<i64: 8, 16>}, {pipeline_mode = #tpu.pipeline_mode<synchronous>, transform_indices = @transform_11, window_bounds = array<i64: 8, 16>}, {pipeline_mode = #tpu.pipeline_mode<synchronous>, transform_indices = @transform_12, window_bounds = array<i64: 16, 80>}, {pipeline_mode = #tpu.pipeline_mode<synchronous>, transform_indices = @transform_13, window_bounds = array<i64: 16, 80>}, {pipeline_mode = #tpu.pipeline_mode<synchronous>, transform_indices = @transform_14, window_bounds = array<i64: 16, 80>}, {pipeline_mode = #tpu.pipeline_mode<synchronous>, transform_indices = @transform_15, window_bounds = array<i64: 80, 1>}, {pipeline_mode = #tpu.pipeline_mode<synchronous>, transform_indices = @transform_16, window_bounds = array<i64: 16, 16>}, {pipeline_mode = #tpu.pipeline_mode<synchronous>, transform_indices = @transform_17, window_bounds = array<i64: 16, 16>}, {pipeline_mode = #tpu.pipeline_mode<synchronous>, transform_indices = @transform_18, window_bounds = array<i64: 16, 16>}, {pipeline_mode = #tpu.pipeline_mode<synchronous>, transform_indices = @transform_19, window_bounds = array<i64: 16, 1>}, {transform_indices = @transform_20, window_bounds = array<i64: 16, 256>}]} {
    %c0 = arith.constant 0 : index
    %c0_0 = arith.constant 0 : index
    %0 = vector.load %arg2[%c0, %c0_0] : memref<256x16xf32, #tpu.memory_space<vmem>>, vector<256x16xf32>
    %c0_1 = arith.constant 0 : index
    %c0_2 = arith.constant 0 : index
    %1 = vector.load %arg3[%c0_1, %c0_2] : memref<256x16xf32, #tpu.memory_space<vmem>>, vector<256x16xf32>
    %c0_3 = arith.constant 0 : index
    %c0_4 = arith.constant 0 : index
    %2 = vector.load %arg4[%c0_3, %c0_4] : memref<256x16xf32, #tpu.memory_space<vmem>>, vector<256x16xf32>
    %c0_5 = arith.constant 0 : index
    %c0_6 = arith.constant 0 : index
    %3 = vector.load %arg5[%c0_5, %c0_6] : memref<256x256xf32, #tpu.memory_space<vmem>>, vector<256x256xf32>
    %c0_7 = arith.constant 0 : index
    %c0_8 = arith.constant 0 : index
    %4 = vector.load %arg6[%c0_7, %c0_8] : memref<80x256xf32, #tpu.memory_space<vmem>>, vector<80x256xf32>
    %c0_9 = arith.constant 0 : index
    %c0_10 = arith.constant 0 : index
    %5 = vector.load %arg1[%c0_9, %c0_10] : memref<8x256xf32, #tpu.memory_space<vmem>>, vector<8x256xf32>
    %cst = arith.constant dense<0.000000e+00> : vector<8x16xf32>
    %6 = tpu.matmul %5, %0, %cst {dimension_numbers = #tpu.dot_dimension_numbers<[1], [0], [0], [1], [0, 0, 1, 1], [], []>} : vector<8x256xf32>, vector<256x16xf32>, vector<8x16xf32> -> vector<8x16xf32>
    %cst_11 = arith.constant dense<0.000000e+00> : vector<8x16xf32>
    %7 = tpu.matmul %5, %1, %cst_11 {dimension_numbers = #tpu.dot_dimension_numbers<[1], [0], [0], [1], [0, 0, 1, 1], [], []>} : vector<8x256xf32>, vector<256x16xf32>, vector<8x16xf32> -> vector<8x16xf32>
    %cst_12 = arith.constant dense<0.000000e+00> : vector<8x16xf32>
    %8 = tpu.matmul %5, %2, %cst_12 {dimension_numbers = #tpu.dot_dimension_numbers<[1], [0], [0], [1], [0, 0, 1, 1], [], []>} : vector<8x256xf32>, vector<256x16xf32>, vector<8x16xf32> -> vector<8x16xf32>
    %c0_13 = arith.constant 0 : index
    %c0_14 = arith.constant 0 : index
    %9 = vector.load %arg7[%c0_13, %c0_14] : memref<8x80xf32, #tpu.memory_space<vmem>>, vector<8x80xf32>
    %cst_15 = arith.constant dense<0.000000e+00> : vector<80x16xf32>
    %10 = tpu.matmul %9, %8, %cst_15 {dimension_numbers = #tpu.dot_dimension_numbers<[0], [0], [1], [1], [0, 1, 1, 1], [], []>} : vector<8x80xf32>, vector<8x16xf32>, vector<80x16xf32> -> vector<80x16xf32>
    %c0_16 = arith.constant 0 : index
    %c0_17 = arith.constant 0 : index
    %11 = vector.load %arg8[%c0_16, %c0_17] : memref<8x80xf32, #tpu.memory_space<vmem>>, vector<8x80xf32>
    %cst_18 = arith.constant dense<0.000000e+00> : vector<80x16xf32>
    %12 = tpu.matmul %11, %6, %cst_18 {dimension_numbers = #tpu.dot_dimension_numbers<[0], [0], [1], [1], [0, 1, 1, 1], [], []>} : vector<8x80xf32>, vector<8x16xf32>, vector<80x16xf32> -> vector<80x16xf32>
    %13 = arith.addf %10, %12 : vector<80x16xf32>
    %c0_19 = arith.constant 0 : index
    %c0_20 = arith.constant 0 : index
    %14 = vector.load %arg9[%c0_19, %c0_20] : memref<8x80xf32, #tpu.memory_space<vmem>>, vector<8x80xf32>
    %cst_21 = arith.constant dense<0.000000e+00> : vector<80x16xf32>
    %15 = tpu.matmul %14, %7, %cst_21 {dimension_numbers = #tpu.dot_dimension_numbers<[0], [0], [1], [1], [0, 1, 1, 1], [], []>} : vector<8x80xf32>, vector<8x16xf32>, vector<80x16xf32> -> vector<80x16xf32>
    %16 = arith.addf %13, %15 : vector<80x16xf32>
    %c0_22 = arith.constant 0 : index
    %c0_23 = arith.constant 0 : index
    %17 = vector.load %arg10[%c0_22, %c0_23] : memref<80x1xf32, #tpu.memory_space<vmem>>, vector<80x1xf32>
    %18 = vector.broadcast %17 : vector<80x1xf32> to vector<80x16xf32>
    %19 = arith.addf %16, %18 : vector<80x16xf32>
    %cst_24 = arith.constant dense<0.000000e+00> : vector<8x256xf32>
    %20 = tpu.matmul %5, %3, %cst_24 {dimension_numbers = #tpu.dot_dimension_numbers<[1], [0], [0], [1], [0, 0, 1, 1], [], []>} : vector<8x256xf32>, vector<256x256xf32>, vector<8x256xf32> -> vector<8x256xf32>
    %c0_25 = arith.constant 0 : index
    %c0_26 = arith.constant 0 : index
    %21 = vector.load %arg11[%c0_25, %c0_26] : memref<8x16xf32, #tpu.memory_space<vmem>>, vector<8x16xf32>
    %cst_27 = arith.constant dense<0.000000e+00> : vector<16x256xf32>
    %22 = tpu.matmul %21, %5, %cst_27 {dimension_numbers = #tpu.dot_dimension_numbers<[0], [0], [1], [1], [0, 1, 1, 1], [], []>} : vector<8x16xf32>, vector<8x256xf32>, vector<16x256xf32> -> vector<16x256xf32>
    %c0_28 = arith.constant 0 : index
    %c0_29 = arith.constant 0 : index
    %23 = vector.load %arg12[%c0_28, %c0_29] : memref<8x16xf32, #tpu.memory_space<vmem>>, vector<8x16xf32>
    %cst_30 = arith.constant dense<0.000000e+00> : vector<16x256xf32>
    %24 = tpu.matmul %23, %20, %cst_30 {dimension_numbers = #tpu.dot_dimension_numbers<[0], [0], [1], [1], [0, 1, 1, 1], [], []>} : vector<8x16xf32>, vector<8x256xf32>, vector<16x256xf32> -> vector<16x256xf32>
    %25 = arith.addf %22, %24 : vector<16x256xf32>
    %26 = vector.extract_strided_slice %19 {offsets = [0, 0], sizes = [16, 16], strides = [1, 1]} : vector<80x16xf32> to vector<16x16xf32>
    %27 = vector.extract_strided_slice %4 {offsets = [0, 0], sizes = [16, 256], strides = [1, 1]} : vector<80x256xf32> to vector<16x256xf32>
    %cst_31 = arith.constant dense<0.000000e+00> : vector<16x256xf32>
    %28 = tpu.matmul %26, %27, %cst_31 {dimension_numbers = #tpu.dot_dimension_numbers<[1], [0], [0], [1], [0, 0, 1, 1], [], []>} : vector<16x16xf32>, vector<16x256xf32>, vector<16x256xf32> -> vector<16x256xf32>
    %29 = arith.addf %25, %28 : vector<16x256xf32>
    %30 = vector.extract_strided_slice %19 {offsets = [16, 0], sizes = [16, 16], strides = [1, 1]} : vector<80x16xf32> to vector<16x16xf32>
    %31 = vector.extract_strided_slice %4 {offsets = [16, 0], sizes = [16, 256], strides = [1, 1]} : vector<80x256xf32> to vector<16x256xf32>
    %cst_32 = arith.constant dense<0.000000e+00> : vector<16x256xf32>
    %32 = tpu.matmul %30, %31, %cst_32 {dimension_numbers = #tpu.dot_dimension_numbers<[1], [0], [0], [1], [0, 0, 1, 1], [], []>} : vector<16x16xf32>, vector<16x256xf32>, vector<16x256xf32> -> vector<16x256xf32>
    %33 = arith.addf %29, %32 : vector<16x256xf32>
    %34 = vector.extract_strided_slice %19 {offsets = [32, 0], sizes = [16, 16], strides = [1, 1]} : vector<80x16xf32> to vector<16x16xf32>
    %35 = vector.extract_strided_slice %4 {offsets = [32, 0], sizes = [16, 256], strides = [1, 1]} : vector<80x256xf32> to vector<16x256xf32>
    %cst_33 = arith.constant dense<0.000000e+00> : vector<16x256xf32>
    %36 = tpu.matmul %34, %35, %cst_33 {dimension_numbers = #tpu.dot_dimension_numbers<[1], [0], [0], [1], [0, 0, 1, 1], [], []>} : vector<16x16xf32>, vector<16x256xf32>, vector<16x256xf32> -> vector<16x256xf32>
    %37 = arith.addf %33, %36 : vector<16x256xf32>
    %38 = vector.extract_strided_slice %19 {offsets = [48, 0], sizes = [16, 16], strides = [1, 1]} : vector<80x16xf32> to vector<16x16xf32>
    %39 = vector.extract_strided_slice %4 {offsets = [48, 0], sizes = [16, 256], strides = [1, 1]} : vector<80x256xf32> to vector<16x256xf32>
    %cst_34 = arith.constant dense<0.000000e+00> : vector<16x256xf32>
    %40 = tpu.matmul %38, %39, %cst_34 {dimension_numbers = #tpu.dot_dimension_numbers<[1], [0], [0], [1], [0, 0, 1, 1], [], []>} : vector<16x16xf32>, vector<16x256xf32>, vector<16x256xf32> -> vector<16x256xf32>
    %41 = arith.addf %37, %40 : vector<16x256xf32>
    %42 = vector.extract_strided_slice %19 {offsets = [64, 0], sizes = [16, 16], strides = [1, 1]} : vector<80x16xf32> to vector<16x16xf32>
    %43 = vector.extract_strided_slice %4 {offsets = [64, 0], sizes = [16, 256], strides = [1, 1]} : vector<80x256xf32> to vector<16x256xf32>
    %cst_35 = arith.constant dense<0.000000e+00> : vector<16x256xf32>
    %44 = tpu.matmul %42, %43, %cst_35 {dimension_numbers = #tpu.dot_dimension_numbers<[1], [0], [0], [1], [0, 0, 1, 1], [], []>} : vector<16x16xf32>, vector<16x256xf32>, vector<16x256xf32> -> vector<16x256xf32>
    %45 = arith.addf %41, %44 : vector<16x256xf32>
    %cst_36 = arith.constant 0.000000e+00 : f32
    %46 = vector.broadcast %cst_36 : f32 to vector<16x256xf32>
    %47 = arith.maximumf %45, %46 : vector<16x256xf32>
    %cst_37 = arith.constant dense<0.000000e+00> : vector<16x16xf32>
    %48 = tpu.matmul %47, %0, %cst_37 {dimension_numbers = #tpu.dot_dimension_numbers<[1], [0], [0], [1], [0, 0, 1, 1], [], []>} : vector<16x256xf32>, vector<256x16xf32>, vector<16x16xf32> -> vector<16x16xf32>
    %cst_38 = arith.constant dense<0.000000e+00> : vector<16x16xf32>
    %49 = tpu.matmul %47, %1, %cst_38 {dimension_numbers = #tpu.dot_dimension_numbers<[1], [0], [0], [1], [0, 0, 1, 1], [], []>} : vector<16x256xf32>, vector<256x16xf32>, vector<16x16xf32> -> vector<16x16xf32>
    %cst_39 = arith.constant dense<0.000000e+00> : vector<16x16xf32>
    %50 = tpu.matmul %47, %2, %cst_39 {dimension_numbers = #tpu.dot_dimension_numbers<[1], [0], [0], [1], [0, 0, 1, 1], [], []>} : vector<16x256xf32>, vector<256x16xf32>, vector<16x16xf32> -> vector<16x16xf32>
    %c0_40 = arith.constant 0 : index
    %c0_41 = arith.constant 0 : index
    %51 = vector.load %arg13[%c0_40, %c0_41] : memref<16x80xf32, #tpu.memory_space<vmem>>, vector<16x80xf32>
    %cst_42 = arith.constant dense<0.000000e+00> : vector<80x16xf32>
    %52 = tpu.matmul %51, %50, %cst_42 {dimension_numbers = #tpu.dot_dimension_numbers<[0], [0], [1], [1], [0, 1, 1, 1], [], []>} : vector<16x80xf32>, vector<16x16xf32>, vector<80x16xf32> -> vector<80x16xf32>
    %c0_43 = arith.constant 0 : index
    %c0_44 = arith.constant 0 : index
    %53 = vector.load %arg14[%c0_43, %c0_44] : memref<16x80xf32, #tpu.memory_space<vmem>>, vector<16x80xf32>
    %cst_45 = arith.constant dense<0.000000e+00> : vector<80x16xf32>
    %54 = tpu.matmul %53, %48, %cst_45 {dimension_numbers = #tpu.dot_dimension_numbers<[0], [0], [1], [1], [0, 1, 1, 1], [], []>} : vector<16x80xf32>, vector<16x16xf32>, vector<80x16xf32> -> vector<80x16xf32>
    %55 = arith.addf %52, %54 : vector<80x16xf32>
    %c0_46 = arith.constant 0 : index
    %c0_47 = arith.constant 0 : index
    %56 = vector.load %arg15[%c0_46, %c0_47] : memref<16x80xf32, #tpu.memory_space<vmem>>, vector<16x80xf32>
    %cst_48 = arith.constant dense<0.000000e+00> : vector<80x16xf32>
    %57 = tpu.matmul %56, %49, %cst_48 {dimension_numbers = #tpu.dot_dimension_numbers<[0], [0], [1], [1], [0, 1, 1, 1], [], []>} : vector<16x80xf32>, vector<16x16xf32>, vector<80x16xf32> -> vector<80x16xf32>
    %58 = arith.addf %55, %57 : vector<80x16xf32>
    %c0_49 = arith.constant 0 : index
    %c0_50 = arith.constant 0 : index
    %59 = vector.load %arg16[%c0_49, %c0_50] : memref<80x1xf32, #tpu.memory_space<vmem>>, vector<80x1xf32>
    %60 = vector.broadcast %59 : vector<80x1xf32> to vector<80x16xf32>
    %61 = arith.addf %58, %60 : vector<80x16xf32>
    %cst_51 = arith.constant dense<0.000000e+00> : vector<16x256xf32>
    %62 = tpu.matmul %47, %3, %cst_51 {dimension_numbers = #tpu.dot_dimension_numbers<[1], [0], [0], [1], [0, 0, 1, 1], [], []>} : vector<16x256xf32>, vector<256x256xf32>, vector<16x256xf32> -> vector<16x256xf32>
    %c0_52 = arith.constant 0 : index
    %c0_53 = arith.constant 0 : index
    %63 = vector.load %arg17[%c0_52, %c0_53] : memref<16x16xf32, #tpu.memory_space<vmem>>, vector<16x16xf32>
    %cst_54 = arith.constant dense<0.000000e+00> : vector<16x256xf32>
    %64 = tpu.matmul %63, %47, %cst_54 {dimension_numbers = #tpu.dot_dimension_numbers<[0], [0], [1], [1], [0, 1, 1, 1], [], []>} : vector<16x16xf32>, vector<16x256xf32>, vector<16x256xf32> -> vector<16x256xf32>
    %c0_55 = arith.constant 0 : index
    %c0_56 = arith.constant 0 : index
    %65 = vector.load %arg18[%c0_55, %c0_56] : memref<16x16xf32, #tpu.memory_space<vmem>>, vector<16x16xf32>
    %cst_57 = arith.constant dense<0.000000e+00> : vector<16x256xf32>
    %66 = tpu.matmul %65, %62, %cst_57 {dimension_numbers = #tpu.dot_dimension_numbers<[0], [0], [1], [1], [0, 1, 1, 1], [], []>} : vector<16x16xf32>, vector<16x256xf32>, vector<16x256xf32> -> vector<16x256xf32>
    %67 = arith.addf %64, %66 : vector<16x256xf32>
    %68 = vector.extract_strided_slice %61 {offsets = [0, 0], sizes = [16, 16], strides = [1, 1]} : vector<80x16xf32> to vector<16x16xf32>
    %69 = vector.extract_strided_slice %4 {offsets = [0, 0], sizes = [16, 256], strides = [1, 1]} : vector<80x256xf32> to vector<16x256xf32>
    %cst_58 = arith.constant dense<0.000000e+00> : vector<16x256xf32>
    %70 = tpu.matmul %68, %69, %cst_58 {dimension_numbers = #tpu.dot_dimension_numbers<[1], [0], [0], [1], [0, 0, 1, 1], [], []>} : vector<16x16xf32>, vector<16x256xf32>, vector<16x256xf32> -> vector<16x256xf32>
    %71 = arith.addf %67, %70 : vector<16x256xf32>
    %72 = vector.extract_strided_slice %61 {offsets = [16, 0], sizes = [16, 16], strides = [1, 1]} : vector<80x16xf32> to vector<16x16xf32>
    %73 = vector.extract_strided_slice %4 {offsets = [16, 0], sizes = [16, 256], strides = [1, 1]} : vector<80x256xf32> to vector<16x256xf32>
    %cst_59 = arith.constant dense<0.000000e+00> : vector<16x256xf32>
    %74 = tpu.matmul %72, %73, %cst_59 {dimension_numbers = #tpu.dot_dimension_numbers<[1], [0], [0], [1], [0, 0, 1, 1], [], []>} : vector<16x16xf32>, vector<16x256xf32>, vector<16x256xf32> -> vector<16x256xf32>
    %75 = arith.addf %71, %74 : vector<16x256xf32>
    %76 = vector.extract_strided_slice %61 {offsets = [32, 0], sizes = [16, 16], strides = [1, 1]} : vector<80x16xf32> to vector<16x16xf32>
    %77 = vector.extract_strided_slice %4 {offsets = [32, 0], sizes = [16, 256], strides = [1, 1]} : vector<80x256xf32> to vector<16x256xf32>
    %cst_60 = arith.constant dense<0.000000e+00> : vector<16x256xf32>
    %78 = tpu.matmul %76, %77, %cst_60 {dimension_numbers = #tpu.dot_dimension_numbers<[1], [0], [0], [1], [0, 0, 1, 1], [], []>} : vector<16x16xf32>, vector<16x256xf32>, vector<16x256xf32> -> vector<16x256xf32>
    %79 = arith.addf %75, %78 : vector<16x256xf32>
    %80 = vector.extract_strided_slice %61 {offsets = [48, 0], sizes = [16, 16], strides = [1, 1]} : vector<80x16xf32> to vector<16x16xf32>
    %81 = vector.extract_strided_slice %4 {offsets = [48, 0], sizes = [16, 256], strides = [1, 1]} : vector<80x256xf32> to vector<16x256xf32>
    %cst_61 = arith.constant dense<0.000000e+00> : vector<16x256xf32>
    %82 = tpu.matmul %80, %81, %cst_61 {dimension_numbers = #tpu.dot_dimension_numbers<[1], [0], [0], [1], [0, 0, 1, 1], [], []>} : vector<16x16xf32>, vector<16x256xf32>, vector<16x256xf32> -> vector<16x256xf32>
    %83 = arith.addf %79, %82 : vector<16x256xf32>
    %84 = vector.extract_strided_slice %61 {offsets = [64, 0], sizes = [16, 16], strides = [1, 1]} : vector<80x16xf32> to vector<16x16xf32>
    %85 = vector.extract_strided_slice %4 {offsets = [64, 0], sizes = [16, 256], strides = [1, 1]} : vector<80x256xf32> to vector<16x256xf32>
    %cst_62 = arith.constant dense<0.000000e+00> : vector<16x256xf32>
    %86 = tpu.matmul %84, %85, %cst_62 {dimension_numbers = #tpu.dot_dimension_numbers<[1], [0], [0], [1], [0, 0, 1, 1], [], []>} : vector<16x16xf32>, vector<16x256xf32>, vector<16x256xf32> -> vector<16x256xf32>
    %87 = arith.addf %83, %86 : vector<16x256xf32>
    %cst_63 = arith.constant 0.000000e+00 : f32
    %88 = vector.broadcast %cst_63 : f32 to vector<16x256xf32>
    %89 = arith.maximumf %87, %88 : vector<16x256xf32>
    %c0_64 = arith.constant 0 : index
    %c0_65 = arith.constant 0 : index
    %90 = vector.load %arg19[%c0_64, %c0_65] : memref<16x16xf32, #tpu.memory_space<vmem>>, vector<16x16xf32>
    %cst_66 = arith.constant dense<0.000000e+00> : vector<16x256xf32>
    %91 = tpu.matmul %90, %89, %cst_66 {dimension_numbers = #tpu.dot_dimension_numbers<[0], [0], [1], [1], [0, 1, 1, 1], [], []>} : vector<16x16xf32>, vector<16x256xf32>, vector<16x256xf32> -> vector<16x256xf32>
    %c0_67 = arith.constant 0 : index
    %c0_68 = arith.constant 0 : index
    %92 = vector.load %arg20[%c0_67, %c0_68] : memref<16x1xf32, #tpu.memory_space<vmem>>, vector<16x1xf32>
    %93 = vector.broadcast %92 : vector<16x1xf32> to vector<16x256xf32>
    %94 = arith.addf %91, %93 : vector<16x256xf32>
    %c0_69 = arith.constant 0 : index
    %c0_70 = arith.constant 0 : index
    %95 = vector.load %arg21[%c0_69, %c0_70] : memref<16x256xf32, #tpu.memory_space<vmem>>, vector<16x256xf32>
    tpu.vector_store %arg21[%c0_69, %c0_70], %94 {strides = array<i32>} : memref<16x256xf32, #tpu.memory_space<vmem>>, vector<16x256xf32>,
    return
  }
  func.func @transform_0(%arg0: i32) -> (i32, i32) {
    %c0_i32 = arith.constant 0 : i32
    %c0_i32_0 = arith.constant 0 : i32
    return %arg0, %c0_i32 : i32, i32
  }
  func.func @transform_1(%arg0: i32) -> (i32, i32) {
    %c0_i32 = arith.constant 0 : i32
    %c0_i32_0 = arith.constant 0 : i32
    %c0_i32_1 = arith.constant 0 : i32
    return %c0_i32, %c0_i32_0 : i32, i32
  }
  func.func @transform_2(%arg0: i32) -> (i32, i32) {
    %c0_i32 = arith.constant 0 : i32
    %c0_i32_0 = arith.constant 0 : i32
    %c0_i32_1 = arith.constant 0 : i32
    return %c0_i32, %c0_i32_0 : i32, i32
  }
  func.func @transform_3(%arg0: i32) -> (i32, i32) {
    %c0_i32 = arith.constant 0 : i32
    %c0_i32_0 = arith.constant 0 : i32
    %c0_i32_1 = arith.constant 0 : i32
    return %c0_i32, %c0_i32_0 : i32, i32
  }
  func.func @transform_4(%arg0: i32) -> (i32, i32) {
    %c0_i32 = arith.constant 0 : i32
    %c0_i32_0 = arith.constant 0 : i32
    %c0_i32_1 = arith.constant 0 : i32
    return %c0_i32, %c0_i32_0 : i32, i32
  }
  func.func @transform_5(%arg0: i32) -> (i32, i32) {
    %c0_i32 = arith.constant 0 : i32
    %c0_i32_0 = arith.constant 0 : i32
    %c0_i32_1 = arith.constant 0 : i32
    return %c0_i32, %c0_i32_0 : i32, i32
  }
  func.func @transform_6(%arg0: i32) -> (i32, i32) {
    %c0_i32 = arith.constant 0 : i32
    %c0_i32_0 = arith.constant 0 : i32
    %c0_i32_1 = arith.constant 0 : i32
    return %c0_i32, %c0_i32_0 : i32, i32
  }
  func.func @transform_7(%arg0: i32) -> (i32, i32) {
    %c0_i32 = arith.constant 0 : i32
    %c0_i32_0 = arith.constant 0 : i32
    %c0_i32_1 = arith.constant 0 : i32
    return %c0_i32, %c0_i32_0 : i32, i32
  }
  func.func @transform_8(%arg0: i32) -> (i32, i32) {
    %c0_i32 = arith.constant 0 : i32
    %c0_i32_0 = arith.constant 0 : i32
    %c0_i32_1 = arith.constant 0 : i32
    return %c0_i32, %c0_i32_0 : i32, i32
  }
  func.func @transform_9(%arg0: i32) -> (i32, i32) {
    %c0_i32 = arith.constant 0 : i32
    %c0_i32_0 = arith.constant 0 : i32
    %c0_i32_1 = arith.constant 0 : i32
    return %c0_i32, %c0_i32_0 : i32, i32
  }
  func.func @transform_10(%arg0: i32) -> (i32, i32) {
    %c0_i32 = arith.constant 0 : i32
    %c0_i32_0 = arith.constant 0 : i32
    %c0_i32_1 = arith.constant 0 : i32
    return %c0_i32, %c0_i32_0 : i32, i32
  }
  func.func @transform_11(%arg0: i32) -> (i32, i32) {
    %c0_i32 = arith.constant 0 : i32
    %c0_i32_0 = arith.constant 0 : i32
    %c0_i32_1 = arith.constant 0 : i32
    return %c0_i32, %c0_i32_0 : i32, i32
  }
  func.func @transform_12(%arg0: i32) -> (i32, i32) {
    %c0_i32 = arith.constant 0 : i32
    %c0_i32_0 = arith.constant 0 : i32
    %c0_i32_1 = arith.constant 0 : i32
    return %c0_i32, %c0_i32_0 : i32, i32
  }
  func.func @transform_13(%arg0: i32) -> (i32, i32) {
    %c0_i32 = arith.constant 0 : i32
    %c0_i32_0 = arith.constant 0 : i32
    %c0_i32_1 = arith.constant 0 : i32
    return %c0_i32, %c0_i32_0 : i32, i32
  }
  func.func @transform_14(%arg0: i32) -> (i32, i32) {
    %c0_i32 = arith.constant 0 : i32
    %c0_i32_0 = arith.constant 0 : i32
    %c0_i32_1 = arith.constant 0 : i32
    return %c0_i32, %c0_i32_0 : i32, i32
  }
  func.func @transform_15(%arg0: i32) -> (i32, i32) {
    %c0_i32 = arith.constant 0 : i32
    %c0_i32_0 = arith.constant 0 : i32
    %c0_i32_1 = arith.constant 0 : i32
    return %c0_i32, %c0_i32_0 : i32, i32
  }
  func.func @transform_16(%arg0: i32) -> (i32, i32) {
    %c0_i32 = arith.constant 0 : i32
    %c0_i32_0 = arith.constant 0 : i32
    %c0_i32_1 = arith.constant 0 : i32
    return %c0_i32, %c0_i32_0 : i32, i32
  }
  func.func @transform_17(%arg0: i32) -> (i32, i32) {
    %c0_i32 = arith.constant 0 : i32
    %c0_i32_0 = arith.constant 0 : i32
    %c0_i32_1 = arith.constant 0 : i32
    return %c0_i32, %c0_i32_0 : i32, i32
  }
  func.func @transform_18(%arg0: i32) -> (i32, i32) {
    %c0_i32 = arith.constant 0 : i32
    %c0_i32_0 = arith.constant 0 : i32
    %c0_i32_1 = arith.constant 0 : i32
    return %c0_i32, %c0_i32_0 : i32, i32
  }
  func.func @transform_19(%arg0: i32) -> (i32, i32) {
    %c0_i32 = arith.constant 0 : i32
    %c0_i32_0 = arith.constant 0 : i32
    %c0_i32_1 = arith.constant 0 : i32
    return %c0_i32, %c0_i32_0 : i32, i32
  }
  func.func @transform_20(%arg0: i32) -> (i32, i32) {
    %c0_i32 = arith.constant 0 : i32
    %c0_i32_0 = arith.constant 0 : i32
    return %arg0, %c0_i32 : i32, i32
  }
}

</mosaic_0001>

<bundles_post_ra>
// kernel: tile.48
= control target key start
LH: loop header
LB: loop body
LE: loop exit
PB: predicated region body
PF: predicated region fallthrough
CT: control target
= control target key end

     0   :  { %s22_s0 = inlined_call_operand.vmem [shape: f32[8], index: 0, kind: input, shape index: {}]   ;;  %s23_s1 = inlined_call_operand.vmem [shape: f32[2,8], index: 1, kind: output, shape index: {}]  }
   0x1   :  { %v4_v0 = vld [vmem:[%s22_s0] ss:$0 sm:$0xff] }
   0x2   :  { %5 = vst [vmem:[%s23_s1] sm:$0x3] %v4_v0 }

// kernel: tile.34
= control target key start
LH: loop header
LB: loop body
LE: loop exit
PB: predicated region body
PF: predicated region fallthrough
CT: control target
= control target key end

     0   :  { %vm7_vm0 = vcmask 64512   ;;  %vm13_vm1 = vcmask 130112   ;;  %s39_s0 = inlined_call_operand.vmem [shape: f32[2,8], index: 0, kind: input, shape index: {}]   ;;  %s40_s1 = inlined_call_operand.vmem [shape: f32[16], index: 1, kind: output, shape index: {}]  }
   0x1   :  { %v4_v0 = vld [vmem:[%s39_s0] sm:$0x3]  ;;  %s22_s0 = smov 8  }
   0x2   :  { %5 = vst [vmem:[#allocation1] sm:$0x3] %v4_v0 }
   0x9   :  { %v10_v1 = vld [vmem:[#allocation1 + $0x1] sm:$0x1]   ;;  %v6_v2 = vld [vmem:[#allocation1] sm:$0x1]  }
   0xa   :  { %11 = vrot.lane.b32.xlu0 %v10_v1, %s22_s0  ;;  %8 = vst.msk [vmem:[#allocation0] sm:$0x1] %vm7_vm0, %v6_v2  }
  0x7c   :  { %v12_v3 = vpop.permute.xlu0 %11  }
  0x7d   :  { %14 = vst.msk [vmem:[#allocation0] sm:$0x1] %vm13_vm1, %v12_v3  }
  0x84   :  { %v17_v4 = vld [vmem:[#allocation0] sm:$0x1] }
  0x85   :  { %20 = vst [vmem:[%s40_s1] sm:$0x1] %v17_v4 }

// kernel: tile.0
= control target key start
LH: loop header
LB: loop body
LE: loop exit
PB: predicated region body
PF: predicated region fallthrough
CT: control target
= control target key end

     0   :  { %s66_s8 = smov 125   ;;  %s67_s9 = smov 123   ;;  %vm7_vm0 = vcmask 7168   ;;  %s117_s0 = inlined_call_operand.vmem [shape: f32[2,8], index: 0, kind: input, shape index: {}]   ;;  %s118_s1 = inlined_call_operand.vmem [shape: f32[16,1], index: 1, kind: output, shape index: {}]  }
   0x1   :  { %v4_v0 = vld [vmem:[%s117_s0] sm:$0x3]  ;;  %s65_s0 = smov 127   ;;  %s68_s10 = smov 126  }
   0x2   :  { %5 = vst [vmem:[#allocation0] sm:$0x3] %v4_v0  ;;  %s69_s11 = smov 124   ;;  %s70_s12 = smov 122  }
   0x3   :  { %s71_s13 = smov 121  }
   0x9   :  { %v9_v1 = vld [vmem:[#allocation0] sm:$0x3]  }
   0xa   :  { %v21_v2 = vld [vmem:[#allocation0] sm:$0x3]   ;;  %10 = vrot.lane.b32.xlu0 %v9_v1, %s65_s0 }
   0xb   :  { %22 = vrot.lane.b32.xlu1 %v21_v2, %s66_s8  ;;  %v33_v3 = vld [vmem:[#allocation0] sm:$0x3]  }
   0xc   :  { %34 = vrot.lane.b32.xlu2 %v33_v3, %s67_s9  ;;  %v15_v4 = vld [vmem:[#allocation0] sm:$0x3]  }
   0xd   :  { %v27_v5 = vld [vmem:[#allocation0] sm:$0x3]  }
   0xe   :  { %v39_v6 = vld [vmem:[#allocation0] sm:$0x3]  }
   0xf   :  { %v45_v7 = vld [vmem:[#allocation0] sm:$0x3]  }
  0x10   :  { %v6_v8 = vld [vmem:[#allocation0] sm:$0x3]  }
  0x11   :  { %8 = vst.msk [vmem:[%s118_s1] ss:$8 sm:$0x3] %vm7_vm0, %v6_v8  }
  0x12   :  { %16 = vrot.lane.b32.xlu0 %v15_v4, %s68_s10 }
  0x13   :  { %28 = vrot.lane.b32.xlu1 %v27_v5, %s69_s11 }
  0x14   :  { %40 = vrot.lane.b32.xlu2 %v39_v6, %s70_s12 }
  0x1a   :  { %46 = vrot.lane.b32.xlu0 %v45_v7, %s71_s13 }
  0x66   :  { %v35_v9 = vpop.permute.xlu2 %34  }
  0x67   :  { %55 = vst.msk [vmem:[%s118_s1 + $0x5] ss:$8 sm:$0x3] %vm7_vm0, %v35_v9  }
  0x6e   :  { %v41_v10 = vpop.permute.xlu2 %40  }
  0x6f   :  { %56 = vst.msk [vmem:[%s118_s1 + $0x6] ss:$8 sm:$0x3] %vm7_vm0, %v41_v10  }
  0x7c   :  { %v11_v11 = vpop.permute.xlu0 %10  }
  0x7d   :  { %v23_v12 = vpop.permute.xlu1 %22   ;;  %51 = vst.msk [vmem:[%s118_s1 + $0x1] ss:$8 sm:$0x3] %vm7_vm0, %v11_v11  }
  0x7e   :  { %53 = vst.msk [vmem:[%s118_s1 + $0x3] ss:$8 sm:$0x3] %vm7_vm0, %v23_v12  }
  0x84   :  { %v17_v13 = vpop.permute.xlu0 %16  }
  0x85   :  { %v29_v14 = vpop.permute.xlu1 %28   ;;  %52 = vst.msk [vmem:[%s118_s1 + $0x2] ss:$8 sm:$0x3] %vm7_vm0, %v17_v13  }
  0x86   :  { %54 = vst.msk [vmem:[%s118_s1 + $0x4] ss:$8 sm:$0x3] %vm7_vm0, %v29_v14  }
  0x8c   :  { %v47_v15 = vpop.permute.xlu0 %46  }
  0x8d   :  { %57 = vst.msk [vmem:[%s118_s1 + $0x7] ss:$8 sm:$0x3] %vm7_vm0, %v47_v15  }

// kernel: net2to2_forward.1
= control target key start
LH: loop header
LB: loop body
LE: loop exit
PB: predicated region body
PF: predicated region fallthrough
CT: control target
= control target key end

     0   :  { %s5081_s0 = inlined_call_operand.vmem [shape: f32[32,256], index: 0, kind: input, shape index: {}]   ;;  %s5082_s1 = inlined_call_operand.vmem [shape: f32[256,16], index: 1, kind: input, shape index: {}]   ;;  %s5083_s2 = inlined_call_operand.vmem [shape: f32[256,16], index: 2, kind: input, shape index: {}]   ;;  %s5084_s3 = inlined_call_operand.vmem [shape: f32[256,16], index: 3, kind: input, shape index: {}]   ;;  %s5085_s4 = inlined_call_operand.vmem [shape: f32[256,256], index: 4, kind: input, shape index: {}]   ;;  %s5086_s5 = inlined_call_operand.vmem [shape: f32[80,256], index: 5, kind: input, shape index: {}]   ;;  %s5087_s6 = inlined_call_operand.vmem [shape: f32[8,80], index: 6, kind: input, shape index: {}]   ;;  %s5088_s7 = inlined_call_operand.vmem [shape: f32[8,80], index: 7, kind: input, shape index: {}]   ;;  %s5089_s8 = inlined_call_operand.vmem [shape: f32[8,80], index: 8, kind: input, shape index: {}]   ;;  %s5090_s9 = inlined_call_operand.vmem [shape: f32[80,1], index: 9, kind: input, shape index: {}]   ;;  %s5091_s10 = inlined_call_operand.vmem [shape: f32[8,16], index: 10, kind: input, shape index: {}]   ;;  %s5092_s11 = inlined_call_operand.vmem [shape: f32[8,16], index: 11, kind: input, shape index: {}]   ;;  %s5093_s12 = inlined_call_operand.vmem [shape: f32[16,80], index: 12, kind: input, shape index: {}]   ;;  %s5094_s13 = inlined_call_operand.vmem [shape: f32[16,80], index: 13, kind: input, shape index: {}]   ;;  %s5095_s14 = inlined_call_operand.vmem [shape: f32[16,80], index: 14, kind: input, shape index: {}]   ;;  %s5096_s15 = inlined_call_operand.vmem [shape: f32[80,1], index: 15, kind: input, shape index: {}]   ;;  %s5097_s16 = inlined_call_operand.vmem [shape: f32[16,16], index: 16, kind: input, shape index: {}]   ;;  %s5098_s17 = inlined_call_operand.vmem [shape: f32[16,16], index: 17, kind: input, shape index: {}]   ;;  %s5099_s18 = inlined_call_operand.vmem [shape: f32[16,16], index: 18, kind: input, shape index: {}]   ;;  %s5100_s19 = inlined_call_operand.vmem [shape: f32[16,1], index: 19, kind: input, shape index: {}]   ;;  %s5101_s20 = inlined_call_operand.vmem [shape: f32[64,256], index: 20, kind: output, shape index: {}]  }
   0x1   :  { %5118 = sst [smem:[#allocation14_spill]] %s5081_s0 }
   0x2   :  { %5119 = sst [smem:[#allocation15_spill]] %s5082_s1  ;;  %s3522_s1 = smov 0  }
   0x3   :  { %5120 = sst [smem:[#allocation16_spill]] %s5083_s2 }
   0x4   :  { %5121 = sst [smem:[#allocation17_spill]] %s5084_s3 }
   0x5   :  { %5122 = sst [smem:[#allocation18_spill]] %s5085_s4 }
   0x6   :  { %5123 = sst [smem:[#allocation19_spill]] %s5088_s7 }
   0x7 LB: > { %s3528_s22 = sadd.s32 4294967295, %s3414_s1   ;;  %p3144_p0 = scmp.ge.s32.totalorder %s3414_s1, 1  ;;  %s3414_s1 = sphi %s3522_s1, %s30_s1  }
   0x8   : > { %p562_p1 = scmp.lt.s32.totalorder %s3414_s1, 5 }
   0xa   : > { %p563_p2 = pnand %p3144_p0, %p562_p1 }
   0xc   : > { %566 = sbr.rel (%p563_p2) target bundleno = 1374 (0x55e), region = 100 }
  0x11   : > { %v1427_v0 = vld [vmem:[%s5092_s11] sm:$0xff]  ;;  %s5124_s7 = sld [smem:[#allocation19_spill]]  ;;  %p621_p3 = scmp.lt.s32.totalorder %s3528_s22, 3  ;;  %vm969_vm0 = vcmask 64512   ;;  %vm1596_vm1 = vcmask 130048  }
  0x12   : > { %v1156_v1 = vld [vmem:[%s5089_s8] sm:$0xff]  ;;  %1428 = vxpose.xlu2.b32.start.end [1/1] (short) (narrow) %v1427_v0, 16  ;;  %s5125_s4 = sld [smem:[#allocation15_spill]] }
  0x13   : > { %1157 = vxpose.xlu1.b32.start.end [1/1] (short) (narrow) %v1156_v1, 80  ;;  %v1426_v18 = vld [vmem:[%s5091_s10] sm:$0xff]  ;;  %s622_s3 = scalar_select %p621_p3, %s3528_s22, 3 }
  0x14   : > { %s5126_s21 = sld [smem:[#allocation14_spill]] }
  0x15   : > { %s3272_s24 = sshll.u32 %s622_s3, 4  ;;  %s5127_s28 = sld [smem:[#allocation17_spill]] }
  0x16   : > { %s5128_s3 = sld [smem:[#allocation16_spill]] }
  0x17   : > { %v936_v2 = vld [vmem:[%s5124_s7] sm:$0xff]  ;;  %s5129_s30 = sld [smem:[#allocation18_spill]] }
  0x18   : > { %v648_v3 = vld [vmem:[%s5125_s4 + $0x78] sm:$0xff]  ;;  %v647_v5 = vld [vmem:[%s5125_s4 + $0x70] sm:$0xff]  ;;  %937 = vxpose.xlu0.b32.start.end [1/1] (short) (narrow) %v936_v2, 80  ;;  %v646_v7 = vld [vmem:[%s5125_s4 + $0x68] sm:$0xff] }
  0x19   : > { %v664_v4 = vld [vmem:[%s5125_s4 + $0xf8] sm:$0xff]  ;;  %815 = vmatpush.msra.mxu0 %v648_v3  ;;  %v663_v6 = vld [vmem:[%s5125_s4 + $0xf0] sm:$0xff]  ;;  %v662_v8 = vld [vmem:[%s5125_s4 + $0xe8] sm:$0xff] }
  0x1a   : > { %835 = vmatpush.msra.mxu1 %v664_v4  ;;  %v645_v9 = vld [vmem:[%s5125_s4 + $0x60] sm:$0xff]  ;;  %v644_v11 = vld [vmem:[%s5125_s4 + $0x58] sm:$0xff]  ;;  %v643_v13 = vld [vmem:[%s5125_s4 + $0x50] sm:$0xff]  ;;  %s625_s23 = scalar_lea.vmem %s5126_s21, %s3272_s24 }
  0x1b   : > { %816 = vmatpush.msra.mxu0 %v647_v5  ;;  %v661_v10 = vld [vmem:[%s5125_s4 + $0xe0] sm:$0xff]  ;;  %v660_v12 = vld [vmem:[%s5125_s4 + $0xd8] sm:$0xff]  ;;  %v659_v14 = vld [vmem:[%s5125_s4 + $0xd0] sm:$0xff] }
  0x1c   : > { %836 = vmatpush.msra.mxu1 %v663_v6  ;;  %v642_v15 = vld [vmem:[%s5125_s4 + $0x48] sm:$0xff]  ;;  %v641_v17 = vld [vmem:[%s5125_s4 + $0x40] sm:$0xff]  ;;  %v640_v20 = vld [vmem:[%s5125_s4 + $0x38] sm:$0xff] }
  0x1d   : > { %817 = vmatpush.msra.mxu0 %v646_v7  ;;  %v658_v16 = vld [vmem:[%s5125_s4 + $0xc8] sm:$0xff]  ;;  %v657_v19 = vld [vmem:[%s5125_s4 + $0xc0] sm:$0xff]  ;;  %v656_v21 = vld [vmem:[%s5125_s4 + $0xb8] sm:$0xff] }
  0x1e   : > { %837 = vmatpush.msra.mxu1 %v662_v8  ;;  %v639_v22 = vld [vmem:[%s5125_s4 + $0x30] sm:$0xff]  ;;  %v638_v24 = vld [vmem:[%s5125_s4 + $0x28] sm:$0xff]  ;;  %v637_v26 = vld [vmem:[%s5125_s4 + $0x20] sm:$0xff] }
  0x1f   : > { %818 = vmatpush.msra.mxu0 %v645_v9  ;;  %v655_v23 = vld [vmem:[%s5125_s4 + $0xb0] sm:$0xff]  ;;  %v654_v25 = vld [vmem:[%s5125_s4 + $0xa8] sm:$0xff]  ;;  %v653_v27 = vld [vmem:[%s5125_s4 + $0xa0] sm:$0xff] }
  0x20   : > { %838 = vmatpush.msra.mxu1 %v661_v10  ;;  %v636_v28 = vld [vmem:[%s5125_s4 + $0x18] sm:$0xff]  ;;  %v635_v30 = vld [vmem:[%s5125_s4 + $0x10] sm:$0xff]  ;;  %v634_v32 = vld [vmem:[%s5125_s4 + $0x8] sm:$0xff] }
  0x21   : > { %819 = vmatpush.msra.mxu0 %v644_v11  ;;  %v652_v29 = vld [vmem:[%s5125_s4 + $0x98] sm:$0xff]  ;;  %v651_v31 = vld [vmem:[%s5125_s4 + $0x90] sm:$0xff]  ;;  %v650_v33 = vld [vmem:[%s5125_s4 + $0x88] sm:$0xff] }
  0x22   : > { %839 = vmatpush.msra.mxu1 %v660_v12  ;;  %1512 = vxpose.xlu2.b32.start.end [1/1] (short) (narrow) %v1426_v18, 16  ;;  %v633_v34 = vld [vmem:[%s5125_s4] sm:$0xff]  ;;  %v3647_v37 = vld [vmem:[%s625_s23 + $0x8] sm:$0xff]  ;;  %v712_v38 = vld [vmem:[%s5127_s28 + $0x78] sm:$0xff] }
  0x23   : > { %820 = vmatpush.msra.mxu0 %v643_v13  ;;  %v649_v35 = vld [vmem:[%s5125_s4 + $0x80] sm:$0xff]  ;;  %v728_v39 = vld [vmem:[%s5127_s28 + $0xf8] sm:$0xff]  ;;  %v711_v42 = vld [vmem:[%s5127_s28 + $0x70] sm:$0xff] }
  0x24   : > { %840 = vmatpush.msra.mxu1 %v659_v14  ;;  %v3645_v36 = vld [vmem:[%s625_s23] sm:$0xff]  ;;  %v680_v40 = vld [vmem:[%s5128_s3 + $0x78] sm:$0xff]  ;;  %v727_v43 = vld [vmem:[%s5127_s28 + $0xf0] sm:$0xff]  ;;  %s3147_s23 = sshll.u32 %s3528_s22, 1 }
  0x25   : > { %821 = vmatpush.msra.mxu0 %v642_v15  ;;  %v3663_v41 = vld [vmem:[%s5128_s3 + $0xf8] sm:$0xff]  ;;  %855 = vmatpush.msra.mxu2 %v680_v40  ;;  %v679_v44 = vld [vmem:[%s5128_s3 + $0x70] sm:$0xff]  ;;  %v710_v46 = vld [vmem:[%s5127_s28 + $0x68] sm:$0xff]  ;;  %p627_p4 = scmp.lt.s32.totalorder %s3147_s23, 7 }
  0x26   : > { %841 = vmatpush.msra.mxu1 %v658_v16  ;;  %875 = vmatpush.msra.mxu3 %v3663_v41  ;;  %v3678_v45 = vld [vmem:[%s5128_s3 + $0xf0] sm:$0xff]  ;;  %v726_v47 = vld [vmem:[%s5127_s28 + $0xe8] sm:$0xff]  ;;  %v709_v50 = vld [vmem:[%s5127_s28 + $0x60] sm:$0xff] }
  0x27   : > { %822 = vmatpush.msra.mxu0 %v641_v17  ;;  %v678_v48 = vld [vmem:[%s5128_s3 + $0x68] sm:$0xff]  ;;  %856 = vmatpush.msra.mxu2 %v679_v44  ;;  %v725_v51 = vld [vmem:[%s5127_s28 + $0xe0] sm:$0xff]  ;;  %v708_v54 = vld [vmem:[%s5127_s28 + $0x58] sm:$0xff]  ;;  %s5155_s23 = smov (!%p627_p4, %s3147_s23), 7 }
  0x28   : > { %842 = vmatpush.msra.mxu1 %v657_v19  ;;  %v3692_v49 = vld [vmem:[%s5128_s3 + $0xe8] sm:$0xff]  ;;  %876 = vmatpush.msra.mxu3 %v3678_v45  ;;  %v677_v52 = vld [vmem:[%s5128_s3 + $0x60] sm:$0xff]  ;;  %v724_v55 = vld [vmem:[%s5127_s28 + $0xd8] sm:$0xff]  ;;  %s3273_s2 = sshll.u32 %s5155_s23, 4 }
  0x29   : > { %823 = vmatpush.msra.mxu0 %v640_v20  ;;  %v3707_v53 = vld [vmem:[%s5128_s3 + $0xe0] sm:$0xff]  ;;  %857 = vmatpush.msra.mxu2 %v678_v48  ;;  %v676_v56 = vld [vmem:[%s5128_s3 + $0x58] sm:$0xff]  ;;  %v707_v58 = vld [vmem:[%s5127_s28 + $0x50] sm:$0xff]  ;;  %s631_s27 = scalar_lea.vmem %s5101_s20, %s3273_s2 }
  0x2a   : > { %843 = vmatpush.msra.mxu1 %v656_v21  ;;  %877 = vmatpush.msra.mxu3 %v3692_v49  ;;  %v3722_v57 = vld [vmem:[%s5128_s3 + $0xd8] sm:$0xff]  ;;  %v723_v59 = vld [vmem:[%s5127_s28 + $0xd0] sm:$0xff]  ;;  %v706_v62 = vld [vmem:[%s5127_s28 + $0x48] sm:$0xff] }
  0x2b   : > { %824 = vmatpush.msra.mxu0 %v639_v22  ;;  %858 = vmatpush.msra.mxu2 %v677_v52  ;;  %v675_v60 = vld [vmem:[%s5128_s3 + $0x50] sm:$0xff]  ;;  %v722_v63 = vld [vmem:[%s5127_s28 + $0xc8] sm:$0xff]  ;;  %v705_v2 = vld [vmem:[%s5127_s28 + $0x40] sm:$0xff] }
  0x2c   : > { %844 = vmatpush.msra.mxu1 %v655_v23  ;;  %878 = vmatpush.msra.mxu3 %v3707_v53  ;;  %v3737_v61 = vld [vmem:[%s5128_s3 + $0xd0] sm:$0xff]  ;;  %v674_v0 = vld [vmem:[%s5128_s3 + $0x48] sm:$0xff]  ;;  %v721_v3 = vld [vmem:[%s5127_s28 + $0xc0] sm:$0xff] }
  0x2d   : > { %825 = vmatpush.msra.mxu0 %v638_v24  ;;  %859 = vmatpush.msra.mxu2 %v676_v56  ;;  %v3752_v1 = vld [vmem:[%s5128_s3 + $0xc8] sm:$0xff]  ;;  %v673_v4 = vld [vmem:[%s5128_s3 + $0x40] sm:$0xff]  ;;  %v704_v6 = vld [vmem:[%s5127_s28 + $0x38] sm:$0xff] }
  0x2e   : > { %845 = vmatpush.msra.mxu1 %v654_v25  ;;  %879 = vmatpush.msra.mxu3 %v3722_v57  ;;  %v3767_v5 = vld [vmem:[%s5128_s3 + $0xc0] sm:$0xff]  ;;  %v720_v7 = vld [vmem:[%s5127_s28 + $0xb8] sm:$0xff]  ;;  %v703_v10 = vld [vmem:[%s5127_s28 + $0x30] sm:$0xff] }
  0x2f   : > { %826 = vmatpush.msra.mxu0 %v637_v26  ;;  %860 = vmatpush.msra.mxu2 %v675_v60  ;;  %v672_v8 = vld [vmem:[%s5128_s3 + $0x38] sm:$0xff]  ;;  %v719_v11 = vld [vmem:[%s5127_s28 + $0xb0] sm:$0xff]  ;;  %v702_v14 = vld [vmem:[%s5127_s28 + $0x28] sm:$0xff] }
  0x30   : > { %846 = vmatpush.msra.mxu1 %v653_v27  ;;  %880 = vmatpush.msra.mxu3 %v3737_v61  ;;  %v3782_v9 = vld [vmem:[%s5128_s3 + $0xb8] sm:$0xff]  ;;  %v671_v12 = vld [vmem:[%s5128_s3 + $0x30] sm:$0xff]  ;;  %v718_v15 = vld [vmem:[%s5127_s28 + $0xa8] sm:$0xff] }
  0x31   : > { %827 = vmatpush.msra.mxu0 %v636_v28  ;;  %861 = vmatpush.msra.mxu2 %v674_v0  ;;  %v3797_v13 = vld [vmem:[%s5128_s3 + $0xb0] sm:$0xff]  ;;  %v670_v16 = vld [vmem:[%s5128_s3 + $0x28] sm:$0xff]  ;;  %v701_v18 = vld [vmem:[%s5127_s28 + $0x20] sm:$0xff] }
  0x32   : > { %847 = vmatpush.msra.mxu1 %v652_v29  ;;  %881 = vmatpush.msra.mxu3 %v3752_v1  ;;  %v3812_v17 = vld [vmem:[%s5128_s3 + $0xa8] sm:$0xff]  ;;  %v717_v19 = vld [vmem:[%s5127_s28 + $0xa0] sm:$0xff]  ;;  %v3833_v22 = vld [vmem:[%s5127_s28 + $0x18] sm:$0xff] }
  0x33   : > { %828 = vmatpush.msra.mxu0 %v635_v30  ;;  %862 = vmatpush.msra.mxu2 %v673_v4  ;;  %v669_v20 = vld [vmem:[%s5128_s3 + $0x20] sm:$0xff]  ;;  %v716_v23 = vld [vmem:[%s5127_s28 + $0x98] sm:$0xff]  ;;  %v3850_v26 = vld [vmem:[%s5127_s28 + $0x10] sm:$0xff] }
  0x34   : > { %848 = vmatpush.msra.mxu1 %v651_v31  ;;  %882 = vmatpush.msra.mxu3 %v3767_v5  ;;  %v3827_v21 = vld [vmem:[%s5128_s3 + $0xa0] sm:$0xff]  ;;  %v668_v24 = vld [vmem:[%s5128_s3 + $0x18] sm:$0xff]  ;;  %v3855_v27 = vld [vmem:[%s5127_s28 + $0x90] sm:$0xff] }
  0x35   : > { %829 = vmatpush.msra.mxu0 %v634_v32  ;;  %863 = vmatpush.msra.mxu2 %v672_v8  ;;  %v3844_v25 = vld [vmem:[%s5128_s3 + $0x98] sm:$0xff]  ;;  %v667_v28 = vld [vmem:[%s5128_s3 + $0x10] sm:$0xff]  ;;  %v3870_v30 = vld [vmem:[%s5127_s28 + $0x8] sm:$0xff] }
  0x36   : > { %849 = vmatpush.msra.mxu1 %v650_v33  ;;  %883 = vmatpush.msra.mxu3 %v3782_v9  ;;  %v3864_v29 = vld [vmem:[%s5128_s3 + $0x90] sm:$0xff]  ;;  %v3875_v31 = vld [vmem:[%s5127_s28 + $0x88] sm:$0xff]  ;;  %v3912_v40 = vld [vmem:[%s5128_s3 + $0x80] sm:$0xff] }
  0x37   : > { %830 = vmatpush.msra.mxu0 %v633_v34  ;;  %864 = vmatpush.msra.mxu2 %v671_v12  ;;  %v666_v32 = vld [vmem:[%s5128_s3 + $0x8] sm:$0xff]  ;;  %v3891_v34 = vld [vmem:[%s5127_s28] sm:$0xff]  ;;  %v1279_v44 = vld [vmem:[%s5090_s9 + $0x18] sm:$0xff] }
  0x38   : > { %850 = vmatpush.msra.mxu1 %v649_v35  ;;  %831 = vmatmul.f32.vlgmr.msra.gmra.mxu0 %v3645_v36  ;;  %v3885_v33 = vld [vmem:[%s5128_s3 + $0x88] sm:$0xff]  ;;  %v3896_v35 = vld [vmem:[%s5127_s28 + $0x80] sm:$0xff]  ;;  %v791_v60 = vld [vmem:[%s5129_s30 + $0x1f0] sm:$0xff] }
  0x39   : > { %851 = vmatmul.f32.vlgmr.msra.gmra.mxu1 %v3647_v37  ;;  %895 = vmatpush.msrb.mxu0 %v712_v38  ;;  %v935_v38 = vld [vmem:[%s5087_s6] sm:$0xff]  ;;  %v787_v0 = vld [vmem:[%s5129_s30 + $0x1d0] sm:$0xff] }
  0x3a   : > { %915 = vmatpush.msrb.mxu1 %v728_v39  ;;  %884 = vmatpush.msra.mxu3 %v3797_v13  ;;  %v665_v39 = vld [vmem:[%s5128_s3] sm:$0xff]  ;;  %v783_v8 = vld [vmem:[%s5129_s30 + $0x1b0] sm:$0xff] }
  0x3b   : > { %896 = vmatpush.msrb.mxu0 %v711_v42  ;;  %865 = vmatpush.msra.mxu2 %v670_v16  ;;  %v3416_v42 = vmov 0   ;;  %v785_v4 = vld [vmem:[%s5129_s30 + $0x1c0] sm:$0xff]  ;;  %v2527_v16 = vld [vmem:[%s5098_s17 + $0x8] sm:$0xff] }
  0x3c   : > { %916 = vmatpush.msrb.mxu1 %v727_v43  ;;  %885 = vmatpush.msra.mxu3 %v3812_v17  ;;  %v1277_v43 = vld [vmem:[%s5090_s9 + $0x8] sm:$0xff]  ;;  %v781_v12 = vld [vmem:[%s5129_s30 + $0x1a0] sm:$0xff] }
  0x3d   : > { %897 = vmatpush.msrb.mxu0 %v710_v46  ;;  %866 = vmatpush.msra.mxu2 %v669_v20  ;;  %v1280_v46 = vld [vmem:[%s5090_s9 + $0x20] sm:$0xff] }
  0x3e   : > { %917 = vmatpush.msrb.mxu1 %v726_v47  ;;  %886 = vmatpush.msra.mxu3 %v3827_v21  ;;  %v1282_v47 = vld [vmem:[%s5090_s9 + $0x30] sm:$0xff] }
  0x3f   : > { %898 = vmatpush.msrb.mxu0 %v709_v50  ;;  %867 = vmatpush.msra.mxu2 %v668_v24  ;;  %v775_v24 = vld [vmem:[%s5129_s30 + $0x170] sm:$0xff] }
  0x40   : > { %918 = vmatpush.msrb.mxu1 %v725_v51  ;;  %887 = vmatpush.msra.mxu3 %v3844_v25  ;;  %v1276_v51 = vld [vmem:[%s5090_s9] sm:$0xff] }
  0x41   : > { %899 = vmatpush.msrb.mxu0 %v708_v54  ;;  %868 = vmatpush.msra.mxu2 %v667_v28  ;;  %v4013_v28 = vld [vmem:[%s5129_s30 + $0x90] sm:$0xff] }
  0x42   : > { %919 = vmatpush.msrb.mxu1 %v724_v55  ;;  %888 = vmatpush.msra.mxu3 %v3864_v29  ;;  %v1281_v55 = vld [vmem:[%s5090_s9 + $0x28] sm:$0xff] }
  0x43   : > { %900 = vmatpush.msrb.mxu0 %v707_v58  ;;  %869 = vmatpush.msra.mxu2 %v666_v32  ;;  %v1283_v58 = vld [vmem:[%s5090_s9 + $0x38] sm:$0xff]  ;;  %v773_v32 = vld [vmem:[%s5129_s30 + $0x160] sm:$0xff] }
  0x44   : > { %920 = vmatpush.msrb.mxu1 %v723_v59  ;;  %889 = vmatpush.msra.mxu3 %v3885_v33 }
  0x45   : > { %901 = vmatpush.msrb.mxu0 %v706_v62  ;;  %870 = vmatpush.msra.mxu2 %v665_v39  ;;  %v789_v62 = vld [vmem:[%s5129_s30 + $0x1e0] sm:$0xff]  ;;  %v771_v39 = vld [vmem:[%s5129_s30 + $0x150] sm:$0xff] }
  0x46   : > { %921 = vmatpush.msrb.mxu1 %v722_v63  ;;  %890 = vmatpush.msra.mxu3 %v3912_v40  ;;  %v1284_v63 = vld [vmem:[%s5090_s9 + $0x40] sm:$0xff] }
  0x47   : > { %902 = vmatpush.msrb.mxu0 %v705_v2  ;;  %871 = vmatmul.f32.vlgmr.msra.gmra.mxu2 %v3645_v36  ;;  %v2526_v2 = vld [vmem:[%s5098_s17] sm:$0xff] }
  0x48   : > { %922 = vmatpush.msrb.mxu1 %v721_v3  ;;  %891 = vmatmul.f32.vlgmr.msra.gmra.mxu3 %v3647_v37  ;;  %v759_v3 = vld [vmem:[%s5129_s30 + $0xf0] sm:$0xff] }
  0x49   : > { %903 = vmatpush.msrb.mxu0 %v704_v6 }
  0x4a   : > { %923 = vmatpush.msrb.mxu1 %v720_v7  ;;  %v757_v7 = vld [vmem:[%s5129_s30 + $0xe0] sm:$0xff] }
  0x4b   : > { %904 = vmatpush.msrb.mxu0 %v703_v10  ;;  %v755_v10 = vld [vmem:[%s5129_s30 + $0xd0] sm:$0xff] }
  0x4c   : > { %924 = vmatpush.msrb.mxu1 %v719_v11  ;;  %v1285_v11 = vld [vmem:[%s5090_s9 + $0x48] sm:$0xff] }
  0x4d   : > { %905 = vmatpush.msrb.mxu0 %v702_v14  ;;  %v3983_v14 = vld [vmem:[%s5129_s30 + $0xc0] sm:$0xff] }
  0x4e   : > { %925 = vmatpush.msrb.mxu1 %v718_v15  ;;  %v779_v15 = vld [vmem:[%s5129_s30 + $0x190] sm:$0xff] }
  0x4f   : > { %906 = vmatpush.msrb.mxu0 %v701_v18  ;;  %v3995_v18 = vld [vmem:[%s5129_s30 + $0xb0] sm:$0xff] }
  0x50   : > { %926 = vmatpush.msrb.mxu1 %v717_v19  ;;  %v777_v19 = vld [vmem:[%s5129_s30 + $0x180] sm:$0xff] }
  0x51   : > { %907 = vmatpush.msrb.mxu0 %v3833_v22 }
  0x52   : > { %927 = vmatpush.msrb.mxu1 %v716_v23  ;;  %v4005_v23 = vld [vmem:[%s5129_s30 + $0xa0] sm:$0xff] }
  0x53   : > { %908 = vmatpush.msrb.mxu0 %v3850_v26 }
  0x54   : > { %928 = vmatpush.msrb.mxu1 %v3855_v27 }
  0x55   : > { %909 = vmatpush.msrb.mxu0 %v3870_v30 }
  0x56   : > { %929 = vmatpush.msrb.mxu1 %v3875_v31 }
  0x57   : > { %910 = vmatpush.msrb.mxu0 %v3891_v34 }
  0x58   : > { %930 = vmatpush.msrb.mxu1 %v3896_v35  ;;  %911 = vmatmul.f32.vlgmr.msrb.gmra.mxu0 %v3645_v36 }
  0x59   : > { %931 = vmatmul.f32.vlgmr.msrb.gmra.mxu1 %v3647_v37 }
  0x5a   : > { %1346 = vmatpush.msra.mxu1 %v759_v3 }
  0x5c   : > { %1347 = vmatpush.msra.mxu1 %v757_v7 }
  0x5e   : > { %1348 = vmatpush.msra.mxu1 %v755_v10 }
  0x60   : > { %1349 = vmatpush.msra.mxu1 %v3983_v14 }
  0x62   : > { %1350 = vmatpush.msra.mxu1 %v3995_v18 }
  0x64   : > { %1351 = vmatpush.msra.mxu1 %v4005_v23 }
  0x66   : > { %3284 = vset.pattern.permute.xlu1 %v3416_v42  ;;  %1352 = vmatpush.msra.mxu1 %v4013_v28 }
  0x68   : > { %1047 = vxpose.xlu0.b32.start.end [1/1] (short) (narrow) %v935_v38, 80  ;;  %v4022_v38 = vld [vmem:[%s5129_s30 + $0x80] sm:$0xff] }
  0x69   : > { %1353 = vmatpush.msra.mxu1 %v4022_v38 }
  0x84   : > { %3286 = vset.pattern.permute.xlu2 %v3416_v42 }
  0x93   : > { %1293 = vperm.xlu2 %3286, %v1277_v43   ;;  %v769_v43 = vld [vmem:[%s5129_s30 + $0x140] sm:$0xff] }
  0x9b   : > { %1303 = vperm.xlu2 %3286, %v1279_v44  }
  0xa3   : > { %1308 = vperm.xlu2 %3286, %v1280_v46   ;;  %v4042_v46 = vld [vmem:[%s5129_s30 + $0x60] sm:$0xff] }
  0xab   : > { %1318 = vperm.xlu2 %3286, %v1282_v47   ;;  %v767_v47 = vld [vmem:[%s5129_s30 + $0x130] sm:$0xff] }
  0xb5   : > { %v832_v48 = vpop.f32.mrf.mxu0  ;;  %1288 = vperm.xlu1 %3284, %v1276_v51  }
  0xb6   : > { %v852_v50 = vpop.f32.mrf.mxu1 }
  0xb7   : > { %v853_v52 = vadd.f32 %v852_v50, %v832_v48  ;;  %v4050_v48 = vld [vmem:[%s5129_s30 + $0x50] sm:$0xff]  ;;  %v765_v50 = vld [vmem:[%s5129_s30 + $0x120] sm:$0xff] }
  0xb9   : > { %1015 = vmatpush.msrb.mxu2 %v853_v52 }
  0xbb   : > { %1366 = vmatpush.msra.mxu2 %v791_v60 }
  0xbc   : > { %v953_v54 = vpop.trf.xlu0 }
  0xbd   : > { %3150 = vmatmul.msk.f32.vlgmr.msrb.gmra.mxu2 %vm969_vm0, %v953_v54  ;;  %1313 = vperm.xlu1 %3284, %v1281_v55   ;;  %v4059_v54 = vld [vmem:[%s5129_s30 + $0x40] sm:$0xff]  ;;  %v763_v55 = vld [vmem:[%s5129_s30 + $0x110] sm:$0xff] }
  0xbe   : > { %1367 = vmatpush.msra.mxu2 %v789_v62  ;;  %v4079_v62 = vld [vmem:[%s5129_s30 + $0x20] sm:$0xff] }
  0xc0   : > { %1368 = vmatpush.msra.mxu2 %v787_v0 }
  0xc2   : > { %1369 = vmatpush.msra.mxu2 %v785_v4  ;;  %v1173_v4 = vpop.trf.xlu1 }
  0xc4   : > { %v954_v56 = vpop.trf.xlu0  ;;  %1370 = vmatpush.msra.mxu2 %v783_v8  ;;  %v760_v8 = vld [vmem:[%s5129_s30 + $0xf8] sm:$0xff] }
  0xc5   : > { %3151 = vmatmul.msk.f32.gmra.mxu2 %vm969_vm0, %v954_v56  ;;  %1323 = vperm.xlu1 %3284, %v1283_v58   ;;  %v4069_v58 = vld [vmem:[%s5129_s30 + $0x30] sm:$0xff] }
  0xc6   : > { %1371 = vmatpush.msra.mxu2 %v781_v12  ;;  %v758_v12 = vld [vmem:[%s5129_s30 + $0xe8] sm:$0xff] }
  0xc8   : > { %1372 = vmatpush.msra.mxu2 %v779_v15 }
  0xca   : > { %1373 = vmatpush.msra.mxu2 %v777_v19  ;;  %v872_v0 = vpop.f32.mrf.mxu2  ;;  %v1174_v10 = vpop.trf.xlu1  ;;  %v756_v19 = vld [vmem:[%s5129_s30 + $0xd8] sm:$0xff] }
  0xcc   : > { %v955_v59 = vpop.trf.xlu0  ;;  %1374 = vmatpush.msra.mxu2 %v775_v24 }
  0xcd   : > { %3152 = vmatmul.msk.f32.gmra.mxu2 %vm969_vm0, %v955_v59  ;;  %1328 = vperm.xlu1 %3284, %v1284_v63   ;;  %v761_v59 = vld [vmem:[%s5129_s30 + $0x100] sm:$0xff]  ;;  %v4084_v63 = vld [vmem:[%s5129_s30 + $0x10] sm:$0xff] }
  0xce   : > { %1375 = vmatpush.msra.mxu2 %v773_v32  ;;  %v2021_v32 = vld [vmem:[%s5094_s13] sm:$0xff] }
  0xcf   : > { %3285 = vset.pattern.permute.xlu0 %v3416_v42  ;;  %v4032_v42 = vld [vmem:[%s5129_s30 + $0x70] sm:$0xff] }
  0xd0   : > { %1376 = vmatpush.msra.mxu2 %v771_v39  ;;  %1354 = vmatpush.msra.mxu1 %v4032_v42 }
  0xd1   : > { %2528 = vxpose.xlu2.b32.start [1/2] (short) (narrow) %v2526_v2, 16  ;;  %v892_v2 = vpop.f32.mrf.mxu3 }
  0xd2   : > { %1377 = vmatpush.msra.mxu2 %v769_v43  ;;  %1355 = vmatpush.msra.mxu1 %v4042_v46  ;;  %v893_v3 = vadd.f32 %v892_v2, %v872_v0  ;;  %v1175_v15 = vpop.trf.xlu1  ;;  %v752_v43 = vld [vmem:[%s5129_s30 + $0xb8] sm:$0xff] }
  0xd3   : > { %v744_v0 = vld [vmem:[%s5129_s30 + $0x78] sm:$0xff] }
  0xd4   : > { %v956_v6 = vpop.trf.xlu0  ;;  %1378 = vmatpush.msra.mxu2 %v767_v47  ;;  %1356 = vmatpush.msra.mxu1 %v4050_v48 }
  0xd5   : > { %3153 = vmatmul.msk.f32.gmra.mxu2 %vm969_vm0, %v956_v6  ;;  %1333 = vperm.xlu1 %3284, %v1285_v11   ;;  %v912_v51 = vpop.f32.mrf.mxu0  ;;  %v4090_v6 = vld [vmem:[%s5129_s30] sm:$0xff] }
  0xd6   : > { %v932_v52 = vpop.f32.mrf.mxu1  ;;  %1379 = vmatpush.msra.mxu2 %v765_v50  ;;  %1357 = vmatpush.msra.mxu1 %v4059_v54  ;;  %v2022_v50 = vld [vmem:[%s5094_s13 + $0x8] sm:$0xff] }
  0xd7   : > { %v933_v56 = vadd.f32 %v932_v52, %v912_v51  ;;  %1234 = vmatpush.msra.mxu0 %v893_v3  ;;  %v748_v52 = vld [vmem:[%s5129_s30 + $0x98] sm:$0xff] }
  0xd8   : > { %1380 = vmatpush.msra.mxu2 %v763_v55  ;;  %1358 = vmatpush.msra.mxu1 %v4069_v58  ;;  %v792_v3 = vld [vmem:[%s5129_s30 + $0x1f8] sm:$0xff] }
  0xd9   : > { %2529 = vxpose.xlu2.b32.end [2/2] (short) (narrow) %v2527_v16, 16  ;;  %1124 = vmatpush.msrb.mxu3 %v933_v56  ;;  %v1278_v56 = vld [vmem:[%s5090_s9 + $0x10] sm:$0xff] }
  0xda   : > { %1381 = vmatpush.msra.mxu2 %v761_v59  ;;  %1359 = vmatpush.msra.mxu1 %v4079_v62  ;;  %v1176_v24 = vpop.trf.xlu1 }
  0xdb   : > { %3170 = vmatmul.msk.f32.vlgmr.msra.gmra.mxu0 %vm969_vm0, %v1173_v4  ;;  %1386 = vmatpush.msra.mxu3 %v760_v8  ;;  %v742_v8 = vld [vmem:[%s5129_s30 + $0x68] sm:$0xff] }
  0xdc   : > { %v957_v20 = vpop.trf.xlu0  ;;  %1360 = vmatpush.msra.mxu1 %v4084_v63 }
  0xdd   : > { %3154 = vmatmul.msk.f32.gmra.mxu2 %vm969_vm0, %v957_v20  ;;  %1387 = vmatpush.msra.mxu3 %v758_v12  ;;  %v754_v20 = vld [vmem:[%s5129_s30 + $0xc8] sm:$0xff] }
  0xde   : > { %1361 = vmatpush.msra.mxu1 %v4090_v6 }
  0xdf   : > { %1362 = vmatmul.f32.vlgmr.msra.gmra.mxu1 %v3645_v36  ;;  %1388 = vmatpush.msra.mxu3 %v756_v19  ;;  %v4168_v19 = vld [vmem:[%s5129_s30 + $0x58] sm:$0xff] }
  0xe0   : > { %1406 = vmatpush.msrb.mxu1 %v792_v3  ;;  %5130 = vst [vmem:[#allocation2_spill] sm:$0xff] %v4168_v19 }
  0xe1   : > { %1389 = vmatpush.msra.mxu3 %v754_v20  ;;  %v782_v20 = vld [vmem:[%s5129_s30 + $0x1a8] sm:$0xff] }
  0xe2   : > { %v1177_v47 = vpop.trf.xlu1 }
  0xe3   : > { %3171 = vmatmul.msk.f32.gmra.mxu0 %vm969_vm0, %v1174_v10  ;;  %1390 = vmatpush.msra.mxu3 %v752_v43  ;;  %v788_v10 = vld [vmem:[%s5129_s30 + $0x1d8] sm:$0xff] }
  0xe4   : > { %v958_v44 = vpop.trf.xlu0 }
  0xe5   : > { %3155 = vmatmul.msk.f32.gmra.mxu2 %vm969_vm0, %v958_v44  ;;  %v750_v44 = vld [vmem:[%s5129_s30 + $0xa8] sm:$0xff] }
  0xe6   : > { %1391 = vmatpush.msra.mxu3 %v750_v44  ;;  %v776_v44 = vld [vmem:[%s5129_s30 + $0x178] sm:$0xff] }
  0xe8   : > { %1392 = vmatpush.msra.mxu3 %v748_v52  ;;  %v4204_v52 = vld [vmem:[%s5129_s30 + $0x28] sm:$0xff] }
  0xe9   : > { %5133 = vst [vmem:[#allocation5_spill] sm:$0xff] %v4204_v52 }
  0xea   : > { %v1178_v55 = vpop.trf.xlu1 }
  0xeb   : > { %3172 = vmatmul.msk.f32.gmra.mxu0 %vm969_vm0, %v1175_v15  ;;  %v784_v15 = vld [vmem:[%s5129_s30 + $0x1b8] sm:$0xff] }
  0xec   : > { %v959_v60 = vpop.trf.xlu0 }
  0xed   : > { %3156 = vmatmul.msk.f32.gmra.mxu2 %vm969_vm0, %v959_v60  ;;  %v746_v60 = vld [vmem:[%s5129_s30 + $0x88] sm:$0xff] }
  0xee   : > { %1393 = vmatpush.msra.mxu3 %v746_v60 }
  0xf0   : > { %1394 = vmatpush.msra.mxu3 %v744_v0  ;;  %v4221_v0 = vld [vmem:[%s5129_s30 + $0x8] sm:$0xff] }
  0xf1   : > { %5135 = vst [vmem:[#allocation7_spill] sm:$0xff] %v4221_v0 }
  0xf2   : > { %v1179_v2 = vpop.trf.xlu1  ;;  %1395 = vmatpush.msra.mxu3 %v742_v8  ;;  %v4242_v8 = vld [vmem:[%s5129_s30 + $0x118] sm:$0xff] }
  0xf3   : > { %3173 = vmatmul.msk.f32.gmra.mxu0 %vm969_vm0, %v1176_v24  ;;  %v780_v24 = vld [vmem:[%s5129_s30 + $0x198] sm:$0xff]  ;;  %5137 = vst [vmem:[#allocation9_spill] sm:$0xff] %v4242_v8 }
  0xf4   : > { %v960_v7 = vpop.trf.xlu0  ;;  %1396 = vmatpush.msra.mxu3 %v4168_v19  ;;  %v804_v19 = vld [vmem:[%s5086_s5 + $0x58] sm:$0xff] }
  0xf5   : > { %3157 = vmatmul.msk.f32.gmra.mxu2 %vm969_vm0, %v960_v7  ;;  %v790_v7 = vld [vmem:[%s5129_s30 + $0x1e8] sm:$0xff] }
  0xf6   : > { %1407 = vmatpush.msrb.mxu1 %v790_v7  ;;  %v4236_v7 = vld [vmem:[%s5129_s30 + $0x128] sm:$0xff] }
  0xf7   : > { %5136 = vst [vmem:[#allocation8_spill] sm:$0xff] %v4236_v7 }
  0xf8   : > { %1408 = vmatpush.msrb.mxu1 %v788_v10 }
  0xfa   : > { %v1180_v12 = vpop.trf.xlu1 }
  0xfb   : > { %3174 = vmatmul.msk.f32.gmra.mxu0 %vm969_vm0, %v1177_v47 }
  0xfc   : > { %v961_v11 = vpop.trf.xlu0 }
  0xfd   : > { %3158 = vmatmul.msk.f32.gmra.mxu2 %vm969_vm0, %v961_v11  ;;  %v786_v11 = vld [vmem:[%s5129_s30 + $0x1c8] sm:$0xff] }
  0xfe   : > { %1409 = vmatpush.msrb.mxu1 %v786_v11  ;;  %v4248_v11 = vld [vmem:[%s5129_s30 + $0x108] sm:$0xff] }
  0xff   : > { %5138 = vst [vmem:[#allocation10_spill] sm:$0xff] %v4248_v11 }
 0x100   : > { %1410 = vmatpush.msrb.mxu1 %v784_v15  ;;  %v2362_v15 = vld [vmem:[%s5096_s15] sm:$0xff] }
 0x102   : > { %1411 = vmatpush.msrb.mxu1 %v782_v20  ;;  %v1181_v43 = vpop.trf.xlu1 }
 0x103   : > { %3175 = vmatmul.msk.f32.gmra.mxu0 %vm969_vm0, %v1178_v55  ;;  %v772_v55 = vld [vmem:[%s5129_s30 + $0x158] sm:$0xff] }
 0x104   : > { %v962_v16 = vpop.trf.xlu0  ;;  %1412 = vmatpush.msrb.mxu1 %v780_v24 }
 0x105   : > { %3159 = vmatmul.msk.f32.gmra.mxu2 %vm969_vm0, %v962_v16 }
 0x10a   : > { %2023 = vxpose.xlu1.b32.start [1/2] (short) (narrow) %v2021_v32, 80  ;;  %v4181_v32 = vld [vmem:[%s5129_s30 + $0x48] sm:$0xff]  ;;  %v1182_v60 = vpop.trf.xlu1 }
 0x10b   : > { %3176 = vmatmul.msk.f32.gmra.mxu0 %vm969_vm0, %v1179_v2  ;;  %5131 = vst [vmem:[#allocation3_spill] sm:$0xff] %v4181_v32  ;;  %1397 = vmatpush.msra.mxu3 %v4181_v32  ;;  %v768_v2 = vld [vmem:[%s5129_s30 + $0x138] sm:$0xff] }
 0x10c   : > { %v1063_v39 = vpop.trf.xlu0 }
 0x10d   : > { %3160 = vmatmul.msk.f32.vlgmr.msrb.gmra.mxu3 %vm969_vm0, %v1063_v39  ;;  %1382 = vmatmul.f32.vlgmr.msra.gmra.mxu2 %v3647_v37  ;;  %v778_v39 = vld [vmem:[%s5129_s30 + $0x188] sm:$0xff] }
 0x10e   : > { %1413 = vmatpush.msrb.mxu1 %v778_v39  ;;  %v2363_v39 = vld [vmem:[%s5096_s15 + $0x8] sm:$0xff] }
 0x110   : > { %1414 = vmatpush.msrb.mxu1 %v776_v44 }
 0x112   : > { %2024 = vxpose.xlu1.b32.end [2/2] (short) (narrow) %v2022_v50, 80  ;;  %v4195_v50 = vld [vmem:[%s5129_s30 + $0x38] sm:$0xff] }
 0x113   : > { %3177 = vmatmul.msk.f32.gmra.mxu0 %vm969_vm0, %v1180_v12  ;;  %5132 = vst [vmem:[#allocation4_spill] sm:$0xff] %v4195_v50  ;;  %1398 = vmatpush.msra.mxu3 %v4195_v50 }
 0x114   : > { %v1064_v51 = vpop.trf.xlu0 }
 0x115   : > { %3161 = vmatmul.msk.f32.gmra.mxu3 %vm969_vm0, %v1064_v51  ;;  %v774_v51 = vld [vmem:[%s5129_s30 + $0x168] sm:$0xff] }
 0x116   : > { %1415 = vmatpush.msrb.mxu1 %v774_v51  ;;  %1399 = vmatpush.msra.mxu3 %v4204_v52 }
 0x118   : > { %1416 = vmatpush.msrb.mxu1 %v772_v55  ;;  %v4274_v55 = vpop.trf.xlu2 }
 0x11b   : > { %3178 = vmatmul.msk.f32.gmra.mxu0 %vm969_vm0, %v1181_v43 }
 0x11c   : > { %v1065_v59 = vpop.trf.xlu0 }
 0x11d   : > { %3162 = vmatmul.msk.f32.gmra.mxu3 %vm969_vm0, %v1065_v59  ;;  %v770_v59 = vld [vmem:[%s5129_s30 + $0x148] sm:$0xff] }
 0x11e   : > { %1298 = vperm.xlu0 %3285, %v1278_v56   ;;  %v4213_v56 = vld [vmem:[%s5129_s30 + $0x18] sm:$0xff]  ;;  %1417 = vmatpush.msrb.mxu1 %v770_v59  ;;  %v2019_v59 = vld [vmem:[%s5093_s12] sm:$0xff] }
 0x11f   : > { %5134 = vst [vmem:[#allocation6_spill] sm:$0xff] %v4213_v56  ;;  %1400 = vmatpush.msra.mxu3 %v4213_v56 }
 0x120   : > { %1418 = vmatpush.msrb.mxu1 %v768_v2 }
 0x121   : > { %1401 = vmatpush.msra.mxu3 %v4221_v0 }
 0x122   : > { %1419 = vmatpush.msrb.mxu1 %v4236_v7 }
 0x123   : > { %3179 = vmatmul.msk.f32.gmra.mxu0 %vm969_vm0, %v1182_v60  ;;  %v2365_v60 = vld [vmem:[%s5096_s15 + $0x18] sm:$0xff] }
 0x124   : > { %v1066_v4 = vpop.trf.xlu0  ;;  %1420 = vmatpush.msrb.mxu1 %v4242_v8  ;;  %v2525_v8 = vld [vmem:[%s5097_s16 + $0x8] sm:$0xff] }
 0x125   : > { %3163 = vmatmul.msk.f32.gmra.mxu3 %vm969_vm0, %v1066_v4  ;;  %v2241_v4 = vld [vmem:[%s5095_s14] sm:$0xff] }
 0x126   : > { %1421 = vmatpush.msrb.mxu1 %v4248_v11 }
 0x127   : > { %1422 = vmatmul.f32.vlgmr.msrb.gmra.mxu1 %v3647_v37  ;;  %v1289_v52 = vpop.permute.xlu1 %1288 }
 0x128   : > { %1565 = vmatpush.msra.mxu1 %v3645_v36 }
 0x12c   : > { %v1067_v16 = vpop.trf.xlu0 }
 0x12d   : > { %3164 = vmatmul.msk.f32.gmra.mxu3 %vm969_vm0, %v1067_v16  ;;  %v2242_v16 = vld [vmem:[%s5095_s14 + $0x8] sm:$0xff] }
 0x134   : > { %v1068_v47 = vpop.trf.xlu0 }
 0x135   : > { %3165 = vmatmul.msk.f32.gmra.mxu3 %vm969_vm0, %v1068_v47  ;;  %v2367_v47 = vld [vmem:[%s5096_s15 + $0x28] sm:$0xff] }
 0x13c   : > { %v1069_v3 = vpop.trf.xlu0 }
 0x13d   : > { %3166 = vmatmul.msk.f32.gmra.mxu3 %vm969_vm0, %v1069_v3  ;;  %v4285_v3 = vpop.trf.xlu2 }
 0x140   : > { %2243 = vxpose.xlu0.b32.start [1/2] (short) (narrow) %v2241_v4, 80  ;;  %v1017_v10 = vpop.f32.mrf.mxu2  ;;  %v2020_v4 = vld [vmem:[%s5093_s12 + $0x8] sm:$0xff] }
 0x142   : > { %2374 = vperm.xlu2 %3286, %v2362_v15  }
 0x144   : > { %v1070_v12 = vpop.trf.xlu0 }
 0x145   : > { %3167 = vmatmul.msk.f32.gmra.mxu3 %vm969_vm0, %v1070_v12  ;;  %v1528_v15 = vpop.trf.xlu2 }
 0x146   : > { %3184 = vmatmul.msk.f32.vlgmr.msra.gmra.mxu1 %vm969_vm0, %v1528_v15 }
 0x148   : > { %2244 = vxpose.xlu0.b32.end [2/2] (short) (narrow) %v2242_v16, 80  ;;  %v4260_v20 = vpop.f32.mrf.mxu2 }
 0x14a   : > { %2379 = vperm.xlu2 %3286, %v2363_v39   ;;  %v794_v39 = vld [vmem:[%s5086_s5 + $0x8] sm:$0xff] }
 0x14c   : > { %v1071_v24 = vpop.trf.xlu0 }
 0x14d   : > { %3168 = vmatmul.msk.f32.gmra.mxu3 %vm969_vm0, %v1071_v24  ;;  %v4295_v24 = vpop.trf.xlu2 }
 0x14e   : > { %3185 = vmatmul.msk.f32.gmra.mxu1 %vm969_vm0, %v4295_v24 }
 0x150   : > { %v4266_v43 = vpop.f32.mrf.mxu2 }
 0x152   : > { %2399 = vperm.xlu2 %3286, %v2367_v47  }
 0x154   : > { %v1072_v44 = vpop.trf.xlu0 }
 0x155   : > { %3169 = vmatmul.msk.f32.gmra.mxu3 %vm969_vm0, %v1072_v44 }
 0x158   : > { %v4272_v51 = vpop.f32.mrf.mxu2  ;;  %v1236_v47 = vpop.f32.mrf.mxu0 }
 0x15a   : > { %2132 = vxpose.xlu1.b32.start [1/2] (short) (narrow) %v2019_v59, 80  ;;  %2389 = vperm.xlu2 %3286, %v2365_v60   ;;  %v2524_v60 = vld [vmem:[%s5097_s16] sm:$0xff] }
 0x15c   : > { %v1363_v7 = vpop.f32.mrf.mxu1 }
 0x15d   : > { %1402 = vmatmul.f32.vlgmr.msra.gmra.mxu3 %v3645_v36  ;;  %v796_v36 = vld [vmem:[%s5086_s5 + $0x18] sm:$0xff] }
 0x15e   : > { %1640 = vmatpush.msrb.mxu0 %v796_v36  ;;  %v4321_v36 = vld [vmem:[%s5086_s5 + $0x20] sm:$0xff] }
 0x15f   : > { %5140 = vst [vmem:[#allocation12_spill] sm:$0xff] %v4321_v36 }
 0x160   : > { %v4283_v2 = vpop.f32.mrf.mxu2  ;;  %1641 = vmatpush.msrb.mxu0 %v794_v39  ;;  %v1239_v11 = vpop.f32.mrf.mxu0 }
 0x162   : > { %2133 = vxpose.xlu1.b32.end [2/2] (short) (narrow) %v2020_v4, 80  ;;  %v4315_v4 = vld [vmem:[%s5086_s5 + $0x30] sm:$0xff]  ;;  %1752 = vmatpush.msra.mxu0 %v804_v19 }
 0x163   : > { %5139 = vst [vmem:[#allocation11_spill] sm:$0xff] %v4315_v4  ;;  %1673 = vmatpush.msrb.mxu1 %v4315_v4 }
 0x165   : > { %1674 = vmatpush.msrb.mxu1 %v4321_v36  ;;  %v4332_v36 = vld [vmem:[%s5086_s5 + $0x38] sm:$0xff] }
 0x168   : > { %v4290_v12 = vpop.f32.mrf.mxu2  ;;  %v1242_v50 = vpop.f32.mrf.mxu0 }
 0x170   : > { %v4293_v16 = vpop.f32.mrf.mxu2 }
 0x178   : > { %v4305_v44 = vpop.f32.mrf.mxu2 }
 0x180   : > { %v4307_v59 = vpop.f32.mrf.mxu2  ;;  %2612 = vxpose.xlu2.b32.start [1/2] (short) (narrow) %v2524_v60, 16 }
 0x188   : > { %v4324_v39 = vpop.f32.mrf.mxu2  ;;  %2613 = vxpose.xlu2.b32.end [2/2] (short) (narrow) %v2525_v8, 16  ;;  %v1245_v8 = vpop.f32.mrf.mxu0 }
 0x190   : > { %v1126_v0 = vpop.f32.mrf.mxu3  ;;  %v1383_v56 = vpop.f32.mrf.mxu2 }
 0x191   : > { %v1127_v4 = vadd.f32 %v1126_v0, %v1017_v10  ;;  %v1384_v60 = vadd.f32 %v1383_v56, %v1363_v7  ;;  %v4345_v56 = vld [vmem:[%s5086_s5 + $0x28] sm:$0xff] }
 0x192   : > { %v802_v7 = vld [vmem:[%s5086_s5 + $0x48] sm:$0xff] }
 0x193   : > { %v1266_v32 = vadd.f32 %v1236_v47, %v1127_v4  ;;  %1481 = vmatpush.msrb.mxu2 %v1384_v60  ;;  %1753 = vmatpush.msra.mxu0 %v802_v7  ;;  %v1299_v60 = vpop.permute.xlu0 %1298 }
 0x194   : > { %3180 = vmatmul.msk.f32.vlgmr.msrb.gmra.mxu2 %vm969_vm0, %v4274_v55 }
 0x195   : > { %v4339_v0 = vadd.f32 %v1289_v52, %v1266_v32  ;;  %1588 = vmatpush.msra.mxu2 %v3647_v37  ;;  %v1294_v32 = vpop.permute.xlu2 %1293 }
 0x197   : > { %1696 = vmatpush.msrb.mxu2 %v4332_v36  ;;  %3190 = vmatmul.msk.f32.vlgmr.msrb.gmra.mxu0 %vm1596_vm1, %v4339_v0 }
 0x198   : > { %v1129_v19 = vpop.f32.mrf.mxu3 }
 0x199   : > { %1697 = vmatpush.msrb.mxu2 %v4345_v56  ;;  %v1130_v37 = vadd.f32 %v1129_v19, %v4260_v20  ;;  %v4365_v20 = vld [vmem:[%s5086_s5 + $0x70] sm:$0xff] }
 0x19a   : > { %1785 = vmatpush.msra.mxu1 %v4365_v20 }
 0x19b   : > { %v1267_v52 = vadd.f32 %v1239_v11, %v1130_v37  ;;  %v4370_v11 = vld [vmem:[%s5086_s5 + $0x78] sm:$0xff]  ;;  %v1248_v37 = vpop.f32.mrf.mxu0 }
 0x19c   : > { %3181 = vmatmul.msk.f32.gmra.mxu2 %vm969_vm0, %v4285_v3 }
 0x19d   : > { %v4357_v10 = vadd.f32 %v1294_v32, %v1267_v52  ;;  %v1304_v32 = vpop.permute.xlu2 %1303  ;;  %v3287_v52 = vld [vmem:[%s5125_s4 + $0x78] sm:$0xff] }
 0x19f   : > { %3191 = vmatmul.msk.f32.gmra.mxu0 %vm1596_vm1, %v4357_v10 }
 0x1a0   : > { %v1132_v47 = vpop.f32.mrf.mxu3 }
 0x1a1   : > { %v1133_v4 = vadd.f32 %v1132_v47, %v4266_v43  ;;  %v4383_v43 = vld [vmem:[%s5086_s5 + $0x68] sm:$0xff] }
 0x1a3   : > { %v1268_v7 = vadd.f32 %v1242_v50, %v1133_v4  ;;  %v4378_v50 = vld [vmem:[%s5086_s5 + $0x60] sm:$0xff]  ;;  %v3288_v4 = vld [vmem:[%s5125_s4 + $0x70] sm:$0xff] }
 0x1a4   : > { %3186 = vmatmul.msk.f32.vlgmr.msra.gmra.mxu2 %vm969_vm0, %v1528_v15  ;;  %5141 = vst [vmem:[#allocation13_spill] sm:$0xff] %v4378_v50  ;;  %1786 = vmatpush.msra.mxu1 %v4378_v50 }
 0x1a5   : > { %v1338_v19 = vadd.f32 %v1299_v60, %v1268_v7  ;;  %1808 = vmatpush.msra.mxu2 %v4370_v11  ;;  %v3289_v7 = vld [vmem:[%s5125_s4 + $0x68] sm:$0xff] }
 0x1a7   : > { %3192 = vmatmul.msk.f32.vlgmr.msrb.gmra.mxu1 %vm1596_vm1, %v1338_v19  ;;  %1809 = vmatpush.msra.mxu2 %v4383_v43 }
 0x1a8   : > { %v1135_v15 = vpop.f32.mrf.mxu3  ;;  %1881 = vmatpush.msrb.mxu1 %v3287_v52  ;;  %v3290_v52 = vld [vmem:[%s5125_s4 + $0x60] sm:$0xff] }
 0x1a9   : > { %v1136_v47 = vadd.f32 %v1135_v15, %v4272_v51  ;;  %v1251_v15 = vpop.f32.mrf.mxu0 }
 0x1aa   : > { %1882 = vmatpush.msrb.mxu1 %v3288_v4 }
 0x1ab   : > { %v1269_v60 = vadd.f32 %v1245_v8, %v1136_v47  ;;  %v3291_v8 = vld [vmem:[%s5125_s4 + $0x58] sm:$0xff]  ;;  %v1309_v47 = vpop.permute.xlu2 %1308 }
 0x1ac   : > { %3187 = vmatmul.msk.f32.gmra.mxu2 %vm969_vm0, %v4295_v24  ;;  %1883 = vmatpush.msrb.mxu1 %v3289_v7 }
 0x1ad   : > { %v1339_v50 = vadd.f32 %v1304_v32, %v1269_v60  ;;  %v3292_v32 = vld [vmem:[%s5125_s4 + $0x50] sm:$0xff]  ;;  %v812_v60 = vld [vmem:[%s5086_s5 + $0x98] sm:$0xff] }
 0x1ae   : > { %1884 = vmatpush.msrb.mxu1 %v3290_v52  ;;  %1864 = vmatpush.msrb.mxu0 %v812_v60  ;;  %v3293_v52 = vld [vmem:[%s5125_s4 + $0xf8] sm:$0xff]  ;;  %v3299_v60 = vld [vmem:[%s5125_s4 + $0xe0] sm:$0xff] }
 0x1af   : > { %3193 = vmatmul.msk.f32.gmra.mxu1 %vm1596_vm1, %v1339_v50 }
 0x1b0   : > { %v1138_v51 = vpop.f32.mrf.mxu3  ;;  %1885 = vmatpush.msrb.mxu1 %v3291_v8  ;;  %v3296_v8 = vld [vmem:[%s5125_s4 + $0x40] sm:$0xff] }
 0x1b1   : > { %v1139_v24 = vadd.f32 %v1138_v51, %v4283_v2  ;;  %v810_v2 = vld [vmem:[%s5086_s5 + $0x88] sm:$0xff] }
 0x1b2   : > { %1886 = vmatpush.msrb.mxu1 %v3292_v32  ;;  %1865 = vmatpush.msrb.mxu0 %v810_v2  ;;  %v1254_v32 = vpop.f32.mrf.mxu0 }
 0x1b3   : > { %v1270_v4 = vadd.f32 %v1248_v37, %v1139_v24  ;;  %v3294_v37 = vld [vmem:[%s5125_s4 + $0x48] sm:$0xff] }
 0x1b4   : > { %3194 = vmatmul.msk.f32.vlgmr.msrb.gmra.mxu2 %vm1596_vm1, %v1338_v19  ;;  %1887 = vmatpush.msrb.mxu1 %v3294_v37  ;;  %v3295_v19 = vld [vmem:[%s5125_s4 + $0xf0] sm:$0xff] }
 0x1b5   : > { %v4415_v7 = vadd.f32 %v1309_v47, %v1270_v4  ;;  %1904 = vmatpush.msrb.mxu2 %v3293_v52  ;;  %v3297_v47 = vld [vmem:[%s5125_s4 + $0xe8] sm:$0xff]  ;;  %v3298_v4 = vld [vmem:[%s5125_s4 + $0x38] sm:$0xff] }
 0x1b6   : > { %1888 = vmatpush.msrb.mxu1 %v3296_v8  ;;  %v3303_v52 = vld [vmem:[%s5125_s4 + $0x28] sm:$0xff]  ;;  %v1319_v8 = vpop.permute.xlu2 %1318 }
 0x1b7   : > { %3198 = vmatmul.msk.f32.vlgmr.msra.gmra.mxu0 %vm1596_vm1, %v4415_v7  ;;  %1905 = vmatpush.msrb.mxu2 %v3295_v19  ;;  %v3305_v19 = vld [vmem:[%s5125_s4 + $0x20] sm:$0xff] }
 0x1b8   : > { %v1141_v51 = vpop.f32.mrf.mxu3  ;;  %1950 = vmatpush.msra.mxu0 %v3663_v41  ;;  %1889 = vmatpush.msrb.mxu1 %v3298_v4 }
 0x1b9   : > { %v1142_v24 = vadd.f32 %v1141_v51, %v4290_v12  ;;  %1906 = vmatpush.msrb.mxu2 %v3297_v47  ;;  %v1314_v12 = vpop.permute.xlu1 %1313  ;;  %v3306_v51 = vld [vmem:[%s5125_s4 + $0xc0] sm:$0xff]  ;;  %v3308_v47 = vld [vmem:[%s5125_s4 + $0xb8] sm:$0xff] }
 0x1ba   : > { %1951 = vmatpush.msra.mxu0 %v3678_v45  ;;  %v3300_v45 = vld [vmem:[%s5125_s4 + $0xd8] sm:$0xff] }
 0x1bb   : > { %v1271_v41 = vadd.f32 %v1251_v15, %v1142_v24  ;;  %1907 = vmatpush.msrb.mxu2 %v3299_v60  ;;  %v3301_v15 = vld [vmem:[%s5125_s4 + $0x30] sm:$0xff]  ;;  %v3307_v24 = vld [vmem:[%s5125_s4 + $0x18] sm:$0xff]  ;;  %v3311_v60 = vld [vmem:[%s5125_s4 + $0x8] sm:$0xff] }
 0x1bc   : > { %3195 = vmatmul.msk.f32.gmra.mxu2 %vm1596_vm1, %v1339_v50  ;;  %1952 = vmatpush.msra.mxu0 %v3692_v49  ;;  %v3302_v49 = vld [vmem:[%s5125_s4 + $0xd0] sm:$0xff] }
 0x1bd   : > { %v4448_v2 = vadd.f32 %v1314_v12, %v1271_v41  ;;  %1908 = vmatpush.msrb.mxu2 %v3300_v45  ;;  %1890 = vmatpush.msrb.mxu1 %v3301_v15  ;;  %v3310_v41 = vld [vmem:[%s5125_s4 + $0xb0] sm:$0xff]  ;;  %v3312_v12 = vld [vmem:[%s5125_s4 + $0xa8] sm:$0xff]  ;;  %v3313_v15 = vld [vmem:[%s5125_s4] sm:$0xff] }
 0x1be   : > { %1953 = vmatpush.msra.mxu0 %v3707_v53  ;;  %v3304_v53 = vld [vmem:[%s5125_s4 + $0xc8] sm:$0xff] }
 0x1bf   : > { %3199 = vmatmul.msk.f32.gmra.mxu0 %vm1596_vm1, %v4448_v2  ;;  %1909 = vmatpush.msrb.mxu2 %v3302_v49  ;;  %v3315_v49 = vld [vmem:[%s5127_s28 + $0x78] sm:$0xff] }
 0x1c0   : > { %v1144_v50 = vpop.f32.mrf.mxu3  ;;  %1954 = vmatpush.msra.mxu0 %v3722_v57  ;;  %1891 = vmatpush.msrb.mxu1 %v3303_v52 }
 0x1c1   : > { %v1145_v37 = vadd.f32 %v1144_v50, %v4293_v16  ;;  %1910 = vmatpush.msrb.mxu2 %v3304_v53  ;;  %v1257_v16 = vpop.f32.mrf.mxu0  ;;  %v3316_v50 = vld [vmem:[%s5125_s4 + $0x98] sm:$0xff]  ;;  %v3318_v53 = vld [vmem:[%s5127_s28 + $0x70] sm:$0xff] }
 0x1c2   : > { %1955 = vmatpush.msra.mxu0 %v3737_v61  ;;  %1892 = vmatpush.msrb.mxu1 %v3305_v19  ;;  %v3319_v19 = vld [vmem:[%s5125_s4 + $0x88] sm:$0xff] }
 0x1c3   : > { %v1272_v57 = vadd.f32 %v1254_v32, %v1145_v37  ;;  %1911 = vmatpush.msrb.mxu2 %v3306_v51  ;;  %v3309_v32 = vld [vmem:[%s5125_s4 + $0x10] sm:$0xff] }
 0x1c4   : > { %1956 = vmatpush.msra.mxu0 %v3752_v1  ;;  %1893 = vmatpush.msrb.mxu1 %v3307_v24  ;;  %v1324_v1 = vpop.permute.xlu1 %1323 }
 0x1c5   : > { %v1342_v61 = vadd.f32 %v1319_v8, %v1272_v57  ;;  %1912 = vmatpush.msrb.mxu2 %v3308_v47  ;;  %v3322_v8 = vld [vmem:[%s5127_s28 + $0xf8] sm:$0xff] }
 0x1c6   : > { %1957 = vmatpush.msra.mxu0 %v3767_v5  ;;  %1894 = vmatpush.msrb.mxu1 %v3309_v32  ;;  %v3327_v32 = vld [vmem:[%s5127_s28 + $0x50] sm:$0xff] }
 0x1c7   : > { %3200 = vmatmul.msk.f32.vlgmr.msra.gmra.mxu1 %vm1596_vm1, %v1342_v61  ;;  %3202 = vmatmul.msk.f32.vlgmr.msra.gmra.mxu2 %vm1596_vm1, %v1342_v61  ;;  %v3325_v61 = vld [vmem:[%s5127_s28 + $0x58] sm:$0xff] }
 0x1c8   : > { %v1147_v4 = vpop.f32.mrf.mxu3  ;;  %1913 = vmatpush.msrb.mxu2 %v3310_v41  ;;  %1958 = vmatpush.msra.mxu0 %v3782_v9  ;;  %v3314_v9 = vld [vmem:[%s5125_s4 + $0xa0] sm:$0xff] }
 0x1c9   : > { %v1148_v5 = vadd.f32 %v1147_v4, %v4305_v44  ;;  %1895 = vmatpush.msrb.mxu1 %v3311_v60  ;;  %v3328_v4 = vld [vmem:[%s5127_s28 + $0xe0] sm:$0xff]  ;;  %v3330_v60 = vld [vmem:[%s5127_s28 + $0xd8] sm:$0xff] }
 0x1ca   : > { %1914 = vmatpush.msrb.mxu2 %v3312_v12  ;;  %1959 = vmatpush.msra.mxu0 %v3797_v13  ;;  %v1260_v13 = vpop.f32.mrf.mxu0  ;;  %v1423_v12 = vpop.f32.mrf.mxu1 }
 0x1cb   : > { %v1273_v45 = vadd.f32 %v1257_v16, %v1148_v5  ;;  %1896 = vmatpush.msrb.mxu1 %v3313_v15  ;;  %v3332_v15 = vld [vmem:[%s5127_s28 + $0xd0] sm:$0xff] }
 0x1cc   : > { %1915 = vmatpush.msrb.mxu2 %v3314_v9  ;;  %1960 = vmatpush.msra.mxu0 %v3812_v17  ;;  %v3317_v17 = vld [vmem:[%s5125_s4 + $0x90] sm:$0xff] }
 0x1cd   : > { %v1343_v44 = vadd.f32 %v1324_v1, %v1273_v45  ;;  %1973 = vmatpush.msra.mxu1 %v3315_v49  ;;  %v3331_v45 = vld [vmem:[%s5127_s28 + $0x40] sm:$0xff] }
 0x1ce   : > { %1916 = vmatpush.msrb.mxu2 %v3316_v50  ;;  %1961 = vmatpush.msra.mxu0 %v3827_v21  ;;  %v1329_v21 = vpop.permute.xlu1 %1328  ;;  %v4589_v50 = vld [vmem:[%s5086_s5 + $0x10] sm:$0xff] }
 0x1cf   : > { %3201 = vmatmul.msk.f32.gmra.mxu1 %vm1596_vm1, %v1343_v44  ;;  %3203 = vmatmul.msk.f32.gmra.mxu2 %vm1596_vm1, %v1343_v44  ;;  %v3333_v44 = vld [vmem:[%s5127_s28 + $0x38] sm:$0xff] }
 0x1d0   : > { %v1150_v52 = vpop.f32.mrf.mxu3  ;;  %1917 = vmatpush.msrb.mxu2 %v3317_v17  ;;  %1962 = vmatpush.msra.mxu0 %v3844_v25  ;;  %v3320_v25 = vld [vmem:[%s5127_s28 + $0x68] sm:$0xff]  ;;  %v3336_v17 = vld [vmem:[%s5127_s28 + $0xc0] sm:$0xff] }
 0x1d1   : > { %v1151_v37 = vadd.f32 %v1150_v52, %v4307_v59  ;;  %1974 = vmatpush.msra.mxu1 %v3318_v53  ;;  %v3321_v59 = vld [vmem:[%s5125_s4 + $0x80] sm:$0xff]  ;;  %v3335_v52 = vld [vmem:[%s5127_s28 + $0x30] sm:$0xff]  ;;  %v3337_v53 = vld [vmem:[%s5127_s28 + $0x28] sm:$0xff] }
 0x1d2   : > { %1918 = vmatpush.msrb.mxu2 %v3319_v19  ;;  %1963 = vmatpush.msra.mxu0 %v3864_v29  ;;  %v3323_v29 = vld [vmem:[%s5127_s28 + $0x60] sm:$0xff]  ;;  %v1263_v24 = vpop.f32.mrf.mxu0 }
 0x1d3   : > { %v1274_v57 = vadd.f32 %v1260_v13, %v1151_v37  ;;  %1975 = vmatpush.msra.mxu1 %v3320_v25  ;;  %v3334_v13 = vld [vmem:[%s5127_s28 + $0xc8] sm:$0xff]  ;;  %v4602_v37 = vld [vmem:[%s5086_s5] sm:$0xff]  ;;  %v3340_v25 = vld [vmem:[%s5127_s28 + $0xb0] sm:$0xff] }
 0x1d4   : > { %1919 = vmatpush.msrb.mxu2 %v3321_v59  ;;  %1964 = vmatpush.msra.mxu0 %v3885_v33  ;;  %v3324_v33 = vld [vmem:[%s5127_s28 + $0xf0] sm:$0xff]  ;;  %v3339_v19 = vld [vmem:[%s5127_s28 + $0x20] sm:$0xff]  ;;  %v3341_v59 = vld [vmem:[%s5127_s28 + $0xa8] sm:$0xff] }
 0x1d5   : > { %v4537_v51 = vadd.f32 %v1329_v21, %v1274_v57  ;;  %1976 = vmatpush.msra.mxu1 %v3323_v29  ;;  %v4611_v21 = vld [vmem:[%s5086_s5 + $0x50] sm:$0xff]  ;;  %v4623_v57 = vld [vmem:[%s5086_s5 + $0x40] sm:$0xff] }
 0x1d6   : > { %1996 = vmatpush.msra.mxu2 %v3322_v8  ;;  %1965 = vmatpush.msra.mxu0 %v3912_v40  ;;  %v3326_v40 = vld [vmem:[%s5127_s28 + $0xe8] sm:$0xff]  ;;  %v1334_v41 = vpop.permute.xlu1 %1333  ;;  %v3342_v8 = vld [vmem:[%s5127_s28 + $0xa0] sm:$0xff]  ;;  %v3345_v29 = vld [vmem:[%s5128_s3 + $0x70] sm:$0xff] }
 0x1d7   : > { %3206 = vmatmul.msk.f32.vlgmr.msrb.gmra.mxu0 %vm1596_vm1, %v4537_v51  ;;  %1977 = vmatpush.msra.mxu1 %v3325_v61  ;;  %v3349_v61 = vld [vmem:[%s5128_s3 + $0x50] sm:$0xff] }
 0x1d8   : > { %1997 = vmatpush.msra.mxu2 %v3324_v33  ;;  %v1153_v16 = vpop.f32.mrf.mxu3  ;;  %v2369_v33 = vld [vmem:[%s5096_s15 + $0x38] sm:$0xff] }
 0x1d9   : > { %v1154_v47 = vadd.f32 %v1153_v16, %v4324_v39  ;;  %1978 = vmatpush.msra.mxu1 %v3327_v32  ;;  %v3329_v39 = vld [vmem:[%s5127_s28 + $0x48] sm:$0xff]  ;;  %v3347_v16 = vld [vmem:[%s5128_s3 + $0x60] sm:$0xff]  ;;  %v3352_v32 = vld [vmem:[%s5128_s3 + $0x38] sm:$0xff] }
 0x1da   : > { %1998 = vmatpush.msra.mxu2 %v3326_v40  ;;  %v3351_v40 = vld [vmem:[%s5128_s3 + $0x40] sm:$0xff] }
 0x1db   : > { %v1275_v1 = vadd.f32 %v1263_v24, %v1154_v47  ;;  %1979 = vmatpush.msra.mxu1 %v3329_v39  ;;  %v3348_v24 = vld [vmem:[%s5128_s3 + $0x58] sm:$0xff]  ;;  %v3350_v47 = vld [vmem:[%s5128_s3 + $0x48] sm:$0xff]  ;;  %v3357_v39 = vld [vmem:[%s5128_s3 + $0x10] sm:$0xff] }
 0x1dc   : > { %1999 = vmatpush.msra.mxu2 %v3328_v4  ;;  %v3354_v4 = vld [vmem:[%s5128_s3 + $0x28] sm:$0xff] }
 0x1dd   : > { %v4567_v5 = vadd.f32 %v1334_v41, %v1275_v1  ;;  %1980 = vmatpush.msra.mxu1 %v3331_v45  ;;  %v3353_v1 = vld [vmem:[%s5128_s3 + $0x30] sm:$0xff]  ;;  %v3356_v41 = vld [vmem:[%s5128_s3 + $0x18] sm:$0xff] }
 0x1de   : > { %2000 = vmatpush.msra.mxu2 %v3330_v60  ;;  %v3358_v60 = vld [vmem:[%s5128_s3 + $0x8] sm:$0xff] }
 0x1df   : > { %3207 = vmatmul.msk.f32.gmra.mxu0 %vm1596_vm1, %v4567_v5  ;;  %1981 = vmatpush.msra.mxu1 %v3333_v44 }
 0x1e0   : > { %2001 = vmatpush.msra.mxu2 %v3332_v15  ;;  %v1403_v9 = vpop.f32.mrf.mxu3 }
 0x1e1   : > { %v1424_v49 = vadd.f32 %v1423_v12, %v1403_v9  ;;  %1982 = vmatpush.msra.mxu1 %v3335_v52  ;;  %v3359_v12 = vld [vmem:[%s5128_s3] sm:$0xff] }
 0x1e2   : > { %2002 = vmatpush.msra.mxu2 %v3334_v13 }
 0x1e3   : > { %1504 = vmatpush.msrb.mxu3 %v1424_v49  ;;  %1983 = vmatpush.msra.mxu1 %v3337_v53 }
 0x1e4   : > { %2003 = vmatpush.msra.mxu2 %v3336_v17  ;;  %3182 = vmatmul.msk.f32.vlgmr.msrb.gmra.mxu3 %vm969_vm0, %v4274_v55  ;;  %v3338_v55 = vld [vmem:[%s5127_s28 + $0xb8] sm:$0xff] }
 0x1e5   : > { %1617 = vmatpush.msra.mxu3 %v4589_v50  ;;  %1984 = vmatpush.msra.mxu1 %v3339_v19 }
 0x1e6   : > { %2004 = vmatpush.msra.mxu2 %v3338_v55 }
 0x1e7   : > { %1618 = vmatpush.msra.mxu3 %v4602_v37  ;;  %1985 = vmatpush.msra.mxu1 %v3833_v22  ;;  %v3343_v22 = vld [vmem:[%s5127_s28 + $0x98] sm:$0xff] }
 0x1e8   : > { %2005 = vmatpush.msra.mxu2 %v3340_v25 }
 0x1e9   : > { %1729 = vmatpush.msrb.mxu3 %v4611_v21  ;;  %1986 = vmatpush.msra.mxu1 %v3850_v26  ;;  %v4650_v26 = vld [vmem:[%s5086_s5 + $0x90] sm:$0xff] }
 0x1ea   : > { %2006 = vmatpush.msra.mxu2 %v3341_v59  ;;  %v1567_v59 = vpop.f32.mrf.mxu1 }
 0x1eb   : > { %1730 = vmatpush.msrb.mxu3 %v4623_v57  ;;  %1987 = vmatpush.msra.mxu1 %v3870_v30  ;;  %v2366_v30 = vld [vmem:[%s5096_s15 + $0x20] sm:$0xff] }
 0x1ec   : > { %2007 = vmatpush.msra.mxu2 %v3342_v8  ;;  %3183 = vmatmul.msk.f32.gmra.mxu3 %vm969_vm0, %v4285_v3  ;;  %v2982_v3 = vld [vmem:[%s5100_s19] sm:$0xff] }
 0x1ed   : > { %1988 = vmatpush.msra.mxu1 %v3891_v34  ;;  %v2364_v34 = vld [vmem:[%s5096_s15 + $0x10] sm:$0xff] }
 0x1ee   : > { %2008 = vmatpush.msra.mxu2 %v3343_v22 }
 0x1f0   : > { %2009 = vmatpush.msra.mxu2 %v3855_v27  ;;  %v4664_v27 = vld [vmem:[%s5086_s5 + $0x80] sm:$0xff] }
 0x1f1   : > { %2986 = vperm.xlu2 %3286, %v2982_v3  }
 0x1f2   : > { %2010 = vmatpush.msra.mxu2 %v3875_v31  ;;  %v2370_v31 = vld [vmem:[%s5096_s15 + $0x40] sm:$0xff] }
 0x1f4   : > { %2011 = vmatpush.msra.mxu2 %v3896_v35  ;;  %3188 = vmatmul.msk.f32.vlgmr.msra.gmra.mxu3 %vm1596_vm1, %v4339_v0  ;;  %v2368_v35 = vld [vmem:[%s5096_s15 + $0x30] sm:$0xff]  ;;  %v2371_v0 = vld [vmem:[%s5096_s15 + $0x48] sm:$0xff] }
 0x1f5   : > { %1841 = vmatpush.msra.mxu3 %v4650_v26 }
 0x1f6   : > { %2394 = vperm.xlu0 %3285, %v2366_v30  }
 0x1f7   : > { %1842 = vmatpush.msra.mxu3 %v4664_v27 }
 0x1fc   : > { %3189 = vmatmul.msk.f32.gmra.mxu3 %vm1596_vm1, %v4357_v10  ;;  %2384 = vperm.xlu1 %3284, %v2364_v34   ;;  %v3344_v10 = vld [vmem:[%s5128_s3 + $0x78] sm:$0xff] }
 0x1fe   : > { %2414 = vperm.xlu0 %3285, %v2370_v31  }
 0x204   : > { %3196 = vmatmul.msk.f32.vlgmr.msrb.gmra.mxu3 %vm1596_vm1, %v4415_v7  ;;  %2419 = vperm.xlu1 %3284, %v2371_v0   ;;  %v3346_v7 = vld [vmem:[%s5128_s3 + $0x68] sm:$0xff] }
 0x205   : > { %1927 = vmatpush.msrb.mxu3 %v3344_v10 }
 0x206   : > { %2404 = vperm.xlu0 %3285, %v2368_v35  }
 0x207   : > { %1928 = vmatpush.msrb.mxu3 %v3345_v29 }
 0x209   : > { %1929 = vmatpush.msrb.mxu3 %v3346_v7 }
 0x20b   : > { %1930 = vmatpush.msrb.mxu3 %v3347_v16 }
 0x20c   : > { %3197 = vmatmul.msk.f32.gmra.mxu3 %vm1596_vm1, %v4448_v2  ;;  %v2983_v2 = vld [vmem:[%s5100_s19 + $0x8] sm:$0xff] }
 0x20d   : > { %1931 = vmatpush.msrb.mxu3 %v3348_v24 }
 0x20e   : > { %2409 = vperm.xlu0 %3285, %v2369_v33   ;;  %v1570_v33 = vpop.f32.mrf.mxu1 }
 0x20f   : > { %1932 = vmatpush.msrb.mxu3 %v3349_v61  ;;  %v3360_v61 = vld [vmem:[%s5129_s30 + $0xf0] sm:$0xff] }
 0x211   : > { %1933 = vmatpush.msrb.mxu3 %v3350_v47 }
 0x213   : > { %1934 = vmatpush.msrb.mxu3 %v3351_v40 }
 0x214   : > { %3204 = vmatmul.msk.f32.vlgmr.msra.gmra.mxu3 %vm1596_vm1, %v4537_v51  ;;  %v3355_v51 = vld [vmem:[%s5128_s3 + $0x20] sm:$0xff]  ;;  %v1643_v9 = vpop.f32.mrf.mxu0 }
 0x215   : > { %1935 = vmatpush.msrb.mxu3 %v3352_v32  ;;  %v3361_v32 = vld [vmem:[%s5129_s30 + $0xe0] sm:$0xff] }
 0x216   : > { %2991 = vperm.xlu0 %3285, %v2983_v2  }
 0x217   : > { %1936 = vmatpush.msrb.mxu3 %v3353_v1 }
 0x219   : > { %1937 = vmatpush.msrb.mxu3 %v3354_v4  ;;  %v3362_v4 = vld [vmem:[%s5129_s30 + $0xd0] sm:$0xff] }
 0x21b   : > { %1938 = vmatpush.msrb.mxu3 %v3355_v51 }
 0x21c   : > { %3205 = vmatmul.msk.f32.gmra.mxu3 %vm1596_vm1, %v4567_v5  ;;  %v1483_v5 = vpop.f32.mrf.mxu2  ;;  %v1646_v49 = vpop.f32.mrf.mxu0 }
 0x21d   : > { %1939 = vmatpush.msrb.mxu3 %v3356_v41 }
 0x21f   : > { %1940 = vmatpush.msrb.mxu3 %v3357_v39 }
 0x221   : > { %1941 = vmatpush.msrb.mxu3 %v3358_v60 }
 0x223   : > { %1942 = vmatpush.msrb.mxu3 %v3359_v12 }
 0x224   : > { %v4744_v45 = vpop.f32.mrf.mxu2  ;;  %v1676_v39 = vpop.f32.mrf.mxu1 }
 0x22c   : > { %v1590_v15 = vpop.f32.mrf.mxu2  ;;  %v1679_v12 = vpop.f32.mrf.mxu1 }
 0x234   : > { %v1593_v44 = vpop.f32.mrf.mxu2  ;;  %v1755_v52 = vpop.f32.mrf.mxu0 }
 0x23c   : > { %v1699_v13 = vpop.f32.mrf.mxu2  ;;  %v1758_v53 = vpop.f32.mrf.mxu0 }
 0x244   : > { %v1702_v17 = vpop.f32.mrf.mxu2 }
 0x24c   : > { %v1811_v22 = vpop.f32.mrf.mxu2 }
 0x254   : > { %v1867_v3 = vpop.f32.mrf.mxu0  ;;  %v1814_v24 = vpop.f32.mrf.mxu2 }
 0x25c   : > { %v1870_v40 = vpop.f32.mrf.mxu0 }
 0x267   : > { %v1506_v55 = vpop.f32.mrf.mxu3 }
 0x268   : > { %v1591_v19 = vadd.f32 %v1590_v15, %v1506_v55  ;;  %v1788_v15 = vpop.f32.mrf.mxu1  ;;  %v3368_v55 = vld [vmem:[%s5129_s30 + $0x1a0] sm:$0xff] }
 0x26a   : > { %v1650_v25 = vadd.f32 %v1643_v9, %v1591_v19 }
 0x26c   : > { %v1706_v8 = vadd.f32 %v1699_v13, %v1650_v25  ;;  %v3367_v13 = vld [vmem:[%s5129_s30 + $0x1b0] sm:$0xff] }
 0x26d   : > { %v3369_v25 = vld [vmem:[%s5129_s30 + $0x190] sm:$0xff] }
 0x26e   : > { %v1762_v30 = vadd.f32 %v1755_v52, %v1706_v8  ;;  %v3371_v8 = vld [vmem:[%s5129_s30 + $0x170] sm:$0xff] }
 0x26f   : > { %v1509_v31 = vpop.f32.mrf.mxu3 }
 0x270   : > { %v1818_v34 = vadd.f32 %v1811_v22, %v1762_v30  ;;  %v1594_v35 = vadd.f32 %v1593_v44, %v1509_v31  ;;  %v3372_v22 = vld [vmem:[%s5129_s30 + $0x160] sm:$0xff]  ;;  %v3373_v30 = vld [vmem:[%s5129_s30 + $0x150] sm:$0xff] }
 0x271   : > { %v3375_v31 = vld [vmem:[%s5129_s30 + $0x130] sm:$0xff] }
 0x272   : > { %v1874_v0 = vadd.f32 %v1867_v3, %v1818_v34  ;;  %v1652_v10 = vadd.f32 %v1646_v49, %v1594_v35  ;;  %v1791_v49 = vpop.f32.mrf.mxu1  ;;  %v3374_v3 = vld [vmem:[%s5129_s30 + $0x140] sm:$0xff]  ;;  %v3377_v35 = vld [vmem:[%s5129_s30 + $0x110] sm:$0xff] }
 0x273   : > { %v3376_v34 = vld [vmem:[%s5129_s30 + $0x120] sm:$0xff] }
 0x274   : > { %v4746_v29 = vmax.f32 %v1874_v0, 0.0  ;;  %v1708_v7 = vadd.f32 %v1702_v17, %v1652_v10  ;;  %v3378_v0 = vld [vmem:[%s5129_s30 + $0x100] sm:$0xff]  ;;  %v2039_v10 = vpop.trf.xlu1 }
 0x276   : > { %v1764_v16 = vadd.f32 %v1758_v53, %v1708_v7  ;;  %1920 = vmatmul.f32.vlgmr.msrb.gmra.mxu2 %v4746_v29  ;;  %1966 = vmatmul.f32.vlgmr.msra.gmra.mxu0 %v4746_v29 }
 0x277   : > { %2432 = vmatpush.msrb.mxu2 %v3360_v61  ;;  %v1620_v47 = vpop.f32.mrf.mxu3 }
 0x278   : > { %v1820_v2 = vadd.f32 %v1814_v24, %v1764_v16 }
 0x279   : > { %2433 = vmatpush.msrb.mxu2 %v3361_v32 }
 0x27a   : > { %v1876_v1 = vadd.f32 %v1870_v40, %v1820_v2 }
 0x27b   : > { %2434 = vmatpush.msrb.mxu2 %v3362_v4 }
 0x27c   : > { %v4759_v51 = vmax.f32 %v1876_v1, 0.0  ;;  %v2040_v7 = vpop.trf.xlu1 }
 0x27d   : > { %2435 = vmatpush.msrb.mxu2 %v3983_v14  ;;  %v1568_v14 = vadd.f32 %v1567_v59, %v1483_v5  ;;  %v3370_v59 = vld [vmem:[%s5129_s30 + $0x180] sm:$0xff] }
 0x27e   : > { %1923 = vmatmul.f32.gmra.mxu2 %v4759_v51  ;;  %1969 = vmatmul.f32.gmra.mxu0 %v4759_v51 }
 0x27f   : > { %2436 = vmatpush.msrb.mxu2 %v3995_v18  ;;  %v1623_v41 = vpop.f32.mrf.mxu3  ;;  %v1649_v18 = vadd.f32 %v1620_v47, %v1568_v14 }
 0x281   : > { %2437 = vmatpush.msrb.mxu2 %v4005_v23 }
 0x283   : > { %2438 = vmatpush.msrb.mxu2 %v4013_v28  ;;  %v1705_v28 = vadd.f32 %v1676_v39, %v1649_v18 }
 0x285   : > { %2439 = vmatpush.msrb.mxu2 %v4022_v38  ;;  %v1571_v38 = vadd.f32 %v1570_v33, %v4744_v45  ;;  %v2041_v33 = vpop.trf.xlu1 }
 0x286   : > { %2012 = vmatmul.f32.vlgmr.msra.gmra.mxu2 %v4746_v29 }
 0x287   : > { %2440 = vmatpush.msrb.mxu2 %v4032_v42  ;;  %v1732_v60 = vpop.f32.mrf.mxu3 }
 0x288   : > { %v1761_v42 = vadd.f32 %v1732_v60, %v1705_v28  ;;  %v2259_v60 = vpop.trf.xlu0 }
 0x289   : > { %2441 = vmatpush.msrb.mxu2 %v4042_v46  ;;  %v1651_v46 = vadd.f32 %v1623_v41, %v1571_v38 }
 0x28b   : > { %2442 = vmatpush.msrb.mxu2 %v4050_v48  ;;  %v3363_v48 = vld [vmem:[%s5129_s30 + $0x1f0] sm:$0xff]  ;;  %v1707_v5 = vadd.f32 %v1679_v12, %v1651_v46 }
 0x28d   : > { %2443 = vmatpush.msrb.mxu2 %v4059_v54  ;;  %v1817_v54 = vadd.f32 %v1788_v15, %v1761_v42  ;;  %v4841_v16 = vpop.trf.xlu1 }
 0x28e   : > { %2015 = vmatmul.f32.gmra.mxu2 %v4759_v51 }
 0x28f   : > { %2444 = vmatpush.msrb.mxu2 %v4069_v58  ;;  %v1735_v23 = vpop.f32.mrf.mxu3 }
 0x290   : > { %v1763_v45 = vadd.f32 %v1735_v23, %v1707_v5  ;;  %v2260_v46 = vpop.trf.xlu0 }
 0x291   : > { %2445 = vmatpush.msrb.mxu2 %v4079_v62  ;;  %v3364_v62 = vld [vmem:[%s5129_s30 + $0x1e0] sm:$0xff] }
 0x292   : > { %v1819_v52 = vadd.f32 %v1791_v49, %v1763_v45 }
 0x293   : > { %2446 = vmatpush.msrb.mxu2 %v4084_v63  ;;  %v3365_v63 = vld [vmem:[%s5129_s30 + $0x1d0] sm:$0xff] }
 0x295   : > { %2447 = vmatpush.msrb.mxu2 %v4090_v6  ;;  %v3366_v6 = vld [vmem:[%s5129_s30 + $0x1c0] sm:$0xff]  ;;  %v4843_v24 = vpop.trf.xlu1 }
 0x297   : > { %2455 = vmatpush.msra.mxu2 %v3363_v48  ;;  %v1844_v58 = vpop.f32.mrf.mxu3 }
 0x298   : > { %v1873_v9 = vadd.f32 %v1844_v58, %v1817_v54  ;;  %v3379_v58 = vld [vmem:[%s5129_s30 + $0xf8] sm:$0xff] }
 0x299   : > { %2456 = vmatpush.msra.mxu2 %v3364_v62  ;;  %v3380_v62 = vld [vmem:[%s5129_s30 + $0xe8] sm:$0xff] }
 0x29a   : > { %v4785_v44 = vmax.f32 %v1873_v9, 0.0 }
 0x29b   : > { %2457 = vmatpush.msra.mxu2 %v3365_v63  ;;  %v3381_v63 = vld [vmem:[%s5129_s30 + $0xd8] sm:$0xff] }
 0x29c   : > { %1897 = vmatmul.f32.vlgmr.msrb.gmra.mxu1 %v4785_v44  ;;  %1943 = vmatmul.f32.vlgmr.msrb.gmra.mxu3 %v4785_v44 }
 0x29d   : > { %2458 = vmatpush.msra.mxu2 %v3366_v6  ;;  %v4845_v61 = vpop.trf.xlu1  ;;  %v3382_v6 = vld [vmem:[%s5129_s30 + $0xc8] sm:$0xff] }
 0x29e   : > { %2448 = vmatmul.f32.vlgmr.msrb.gmra.mxu2 %v4785_v44 }
 0x29f   : > { %2459 = vmatpush.msra.mxu2 %v3367_v13  ;;  %v1847_v17 = vpop.f32.mrf.mxu3 }
 0x2a0   : > { %v1875_v53 = vadd.f32 %v1847_v17, %v1819_v52  ;;  %v3383_v52 = vld [vmem:[%s5129_s30 + $0xb8] sm:$0xff]  ;;  %v2261_v17 = vpop.trf.xlu0 }
 0x2a1   : > { %2460 = vmatpush.msra.mxu2 %v3368_v55 }
 0x2a2   : > { %v4802_v19 = vmax.f32 %v1875_v53, 0.0 }
 0x2a3   : > { %2461 = vmatpush.msra.mxu2 %v3369_v25  ;;  %v3384_v25 = vld [vmem:[%s5129_s30 + $0xa8] sm:$0xff] }
 0x2a4   : > { %1900 = vmatmul.f32.gmra.mxu1 %v4802_v19  ;;  %1946 = vmatmul.f32.gmra.mxu3 %v4802_v19 }
 0x2a5   : > { %2462 = vmatpush.msra.mxu2 %v3370_v59  ;;  %v4847_v47 = vpop.trf.xlu1 }
 0x2a6   : > { %2451 = vmatmul.f32.gmra.mxu2 %v4802_v19 }
 0x2a7   : > { %2463 = vmatpush.msra.mxu2 %v3371_v8  ;;  %v3385_v8 = vld [vmem:[%s5129_s30 + $0x98] sm:$0xff] }
 0x2a9   : > { %2464 = vmatpush.msra.mxu2 %v3372_v22 }
 0x2ab   : > { %2465 = vmatpush.msra.mxu2 %v3373_v30 }
 0x2ac   : > { %1989 = vmatmul.f32.vlgmr.msra.gmra.mxu1 %v4785_v44 }
 0x2ad   : > { %2466 = vmatpush.msra.mxu2 %v3374_v3  ;;  %v4849_v40 = vpop.trf.xlu1  ;;  %v3388_v3 = vld [vmem:[%s5129_s30 + $0x78] sm:$0xff] }
 0x2af   : > { %2467 = vmatpush.msra.mxu2 %v3375_v31  ;;  %v3389_v31 = vld [vmem:[%s5129_s30 + $0x1e8] sm:$0xff] }
 0x2b1   : > { %2468 = vmatpush.msra.mxu2 %v3376_v34  ;;  %v2262_v34 = vpop.trf.xlu0 }
 0x2b3   : > { %2469 = vmatpush.msra.mxu2 %v3377_v35  ;;  %v3390_v35 = vld [vmem:[%s5129_s30 + $0x68] sm:$0xff] }
 0x2b4   : > { %1992 = vmatmul.f32.gmra.mxu1 %v4802_v19 }
 0x2b5   : > { %2470 = vmatpush.msra.mxu2 %v3378_v0  ;;  %v4851_v1 = vpop.trf.xlu1  ;;  %v3391_v0 = vld [vmem:[%s5129_s30 + $0x1d8] sm:$0xff] }
 0x2b6   : > { %2471 = vmatmul.f32.vlgmr.msra.gmra.mxu2 %v4746_v29 }
 0x2bd   : > { %v4853_v39 = vpop.trf.xlu1 }
 0x2be   : > { %2474 = vmatmul.f32.gmra.mxu2 %v4759_v51 }
 0x2c5   : > { %v2148_v42 = vpop.trf.xlu1 }
 0x2cd   : > { %v2149_v49 = vpop.trf.xlu1 }
 0x2d5   : > { %v2150_v30 = vpop.trf.xlu1 }
 0x2f3   : > { %v1967_v14 = vpop.f32.mrf.mxu0 }
 0x2f9   : > { %v1921_v2 = vpop.f32.mrf.mxu2 }
 0x2fb   : > { %v1970_v48 = vpop.f32.mrf.mxu0 }
 0x301   : > { %v1924_v32 = vpop.f32.mrf.mxu2 }
 0x309   : > { %v2013_v4 = vpop.f32.mrf.mxu2 }
 0x311   : > { %v2016_v12 = vpop.f32.mrf.mxu2 }
 0x319   : > { %v1898_v41 = vpop.f32.mrf.mxu1 }
 0x31a   : > { %v1922_v38 = vadd.f32 %v1921_v2, %v1898_v41  ;;  %v3393_v2 = vld [vmem:[%s5129_s30 + $0x1b8] sm:$0xff]  ;;  %v3394_v41 = vld [vmem:[%s5129_s30 + $0x1a8] sm:$0xff] }
 0x31f   : > { %v1944_v18 = vpop.f32.mrf.mxu3 }
 0x320   : > { %v1968_v45 = vadd.f32 %v1967_v14, %v1944_v18  ;;  %v3395_v18 = vld [vmem:[%s5129_s30 + $0x198] sm:$0xff] }
 0x321   : > { %v1901_v23 = vpop.f32.mrf.mxu1  ;;  %v4855_v15 = vpop.f32.mrf.mxu2 }
 0x322   : > { %v1925_v28 = vadd.f32 %v1924_v32, %v1901_v23  ;;  %v2263_v23 = vpop.trf.xlu0 }
 0x324   : > { %2099 = vmatpush.msra.mxu3 %v1925_v28  ;;  %v5145_v28 = vld [vmem:[#allocation5_spill] sm:$0xff] }
 0x326   : > { %2100 = vmatpush.msra.mxu3 %v1922_v38  ;;  %v3396_v38 = vld [vmem:[%s5129_s30 + $0x188] sm:$0xff] }
 0x327   : > { %3208 = vmatmul.msk.f32.vlgmr.msra.gmra.mxu3 %vm1596_vm1, %v2039_v10  ;;  %v1947_v54 = vpop.f32.mrf.mxu3  ;;  %v5142_v10 = vld [vmem:[#allocation2_spill] sm:$0xff] }
 0x328   : > { %2478 = vmatpush.msrb.mxu3 %v3379_v58  ;;  %v1971_v5 = vadd.f32 %v1970_v48, %v1947_v54  ;;  %v5147_v48 = vld [vmem:[#allocation7_spill] sm:$0xff] }
 0x329   : > { %v1990_v9 = vpop.f32.mrf.mxu1  ;;  %v2452_v13 = vpop.f32.mrf.mxu2 }
 0x32a   : > { %2479 = vmatpush.msrb.mxu3 %v3380_v62  ;;  %2319 = vmatpush.msrb.mxu1 %v1971_v5  ;;  %v2014_v59 = vadd.f32 %v2013_v4, %v1990_v9  ;;  %v5143_v4 = vld [vmem:[#allocation3_spill] sm:$0xff]  ;;  %v2264_v5 = vpop.trf.xlu0  ;;  %v5149_v9 = vld [vmem:[#allocation9_spill] sm:$0xff]  ;;  %v5150_v62 = vld [vmem:[#allocation10_spill] sm:$0xff] }
 0x32c   : > { %2480 = vmatpush.msrb.mxu3 %v3381_v63  ;;  %2320 = vmatpush.msrb.mxu1 %v1968_v45 }
 0x32d   : > { %3228 = vmatmul.msk.f32.vlgmr.msrb.gmra.mxu1 %vm1596_vm1, %v2259_v60  ;;  %v4921_v60 = vpop.trf.xlu2 }
 0x32e   : > { %2687 = vmatpush.msra.mxu1 %v4759_v51  ;;  %2481 = vmatpush.msrb.mxu3 %v3382_v6 }
 0x32f   : > { %3209 = vmatmul.msk.f32.gmra.mxu3 %vm1596_vm1, %v2040_v7  ;;  %v3392_v7 = vld [vmem:[%s5129_s30 + $0x1c8] sm:$0xff] }
 0x330   : > { %2688 = vmatpush.msra.mxu1 %v4746_v29  ;;  %2482 = vmatpush.msrb.mxu3 %v3383_v52 }
 0x331   : > { %v1993_v53 = vpop.f32.mrf.mxu1 }
 0x332   : > { %2795 = vmatpush.msrb.mxu1 %v4332_v36  ;;  %v2017_v55 = vadd.f32 %v2016_v12, %v1993_v53  ;;  %2483 = vmatpush.msrb.mxu3 %v3384_v25  ;;  %v3386_v36 = vld [vmem:[%s5129_s30 + $0x88] sm:$0xff]  ;;  %v5144_v12 = vld [vmem:[#allocation4_spill] sm:$0xff] }
 0x333   : > { %v5152_v25 = vld [vmem:[#allocation12_spill] sm:$0xff] }
 0x334   : > { %2796 = vmatpush.msrb.mxu1 %v4345_v56  ;;  %2208 = vmatpush.msrb.mxu0 %v2017_v55  ;;  %v3387_v56 = vld [vmem:[%s5129_s30 + $0x1f8] sm:$0xff] }
 0x335   : > { %2484 = vmatpush.msrb.mxu3 %v3385_v8  ;;  %3229 = vmatmul.msk.f32.gmra.mxu1 %vm1596_vm1, %v2260_v46  ;;  %v3398_v46 = vld [vmem:[%s5129_s30 + $0x168] sm:$0xff]  ;;  %v4952_v54 = vpop.trf.xlu2 }
 0x336   : > { %2209 = vmatpush.msrb.mxu0 %v2014_v59 }
 0x337   : > { %2485 = vmatpush.msrb.mxu3 %v3386_v36  ;;  %3218 = vmatmul.msk.f32.vlgmr.msrb.gmra.mxu0 %vm1596_vm1, %v2148_v42  ;;  %v3397_v42 = vld [vmem:[%s5129_s30 + $0x178] sm:$0xff] }
 0x338   : > { %3210 = vmatmul.msk.f32.gmra.mxu3 %vm1596_vm1, %v2041_v33  ;;  %2501 = vmatpush.msra.mxu0 %v3387_v56 }
 0x339   : > { %v2472_v22 = vpop.f32.mrf.mxu2  ;;  %2486 = vmatpush.msrb.mxu3 %v3388_v3 }
 0x33a   : > { %2502 = vmatpush.msra.mxu0 %v3389_v31  ;;  %v2473_v14 = vadd.f32 %v2472_v22, %v4855_v15  ;;  %v5146_v15 = vld [vmem:[#allocation6_spill] sm:$0xff] }
 0x33b   : > { %2487 = vmatpush.msrb.mxu3 %v3390_v35 }
 0x33c   : > { %2503 = vmatpush.msra.mxu0 %v3391_v0 }
 0x33d   : > { %2488 = vmatpush.msrb.mxu3 %v5142_v10  ;;  %3230 = vmatmul.msk.f32.gmra.mxu1 %vm1596_vm1, %v2261_v17  ;;  %v2375_v45 = vpop.permute.xlu2 %2374 }
 0x33e   : > { %2504 = vmatpush.msra.mxu0 %v3392_v7 }
 0x33f   : > { %3219 = vmatmul.msk.f32.gmra.mxu0 %vm1596_vm1, %v2149_v49  ;;  %2489 = vmatpush.msrb.mxu3 %v5143_v4 }
 0x340   : > { %3211 = vmatmul.msk.f32.gmra.mxu3 %vm1596_vm1, %v4841_v16  ;;  %2505 = vmatpush.msra.mxu0 %v3393_v2  ;;  %v2151_v16 = vpop.trf.xlu1 }
 0x341   : > { %v2475_v33 = vpop.f32.mrf.mxu2  ;;  %2490 = vmatpush.msrb.mxu3 %v5144_v12 }
 0x342   : > { %v2476_v32 = vadd.f32 %v2475_v33, %v2452_v13  ;;  %2506 = vmatpush.msra.mxu0 %v3394_v41 }
 0x343   : > { %2491 = vmatpush.msrb.mxu3 %v5145_v28 }
 0x344   : > { %2580 = vmatpush.msrb.mxu2 %v2476_v32  ;;  %2507 = vmatpush.msra.mxu0 %v3395_v18  ;;  %v2981_v18 = vld [vmem:[%s5099_s18 + $0x8] sm:$0xff] }
 0x345   : > { %3231 = vmatmul.msk.f32.gmra.mxu1 %vm1596_vm1, %v2262_v34  ;;  %2492 = vmatpush.msrb.mxu3 %v5146_v15 }
 0x346   : > { %2581 = vmatpush.msrb.mxu2 %v2473_v14  ;;  %2508 = vmatpush.msra.mxu0 %v3396_v38 }
 0x347   : > { %3238 = vmatmul.msk.f32.vlgmr.msrb.gmra.mxu2 %vm1596_vm1, %v4921_v60  ;;  %3220 = vmatmul.msk.f32.gmra.mxu0 %vm1596_vm1, %v2150_v30 }
 0x348   : > { %3212 = vmatmul.msk.f32.gmra.mxu3 %vm1596_vm1, %v4843_v24  ;;  %2509 = vmatpush.msra.mxu0 %v3397_v42  ;;  %v3399_v24 = vld [vmem:[%s5129_s30 + $0x158] sm:$0xff]  ;;  %v2152_v58 = vpop.trf.xlu1 }
 0x349   : > { %2716 = vmatpush.msra.mxu2 %v4589_v50  ;;  %2493 = vmatpush.msrb.mxu3 %v5147_v48  ;;  %v3400_v50 = vld [vmem:[%s5129_s30 + $0x148] sm:$0xff] }
 0x34a   : > { %2510 = vmatpush.msra.mxu0 %v3398_v46 }
 0x34b   : > { %2717 = vmatpush.msra.mxu2 %v4602_v37  ;;  %v3401_v37 = vld [vmem:[%s5129_s30 + $0x138] sm:$0xff] }
 0x34c   : > { %2511 = vmatpush.msra.mxu0 %v3399_v24 }
 0x34d   : > { %2828 = vmatpush.msrb.mxu2 %v4611_v21  ;;  %3232 = vmatmul.msk.f32.gmra.mxu1 %vm1596_vm1, %v2263_v23  ;;  %v5148_v21 = vld [vmem:[#allocation8_spill] sm:$0xff] }
 0x34e   : > { %2512 = vmatpush.msra.mxu0 %v3400_v50 }
 0x34f   : > { %3239 = vmatmul.msk.f32.gmra.mxu2 %vm1596_vm1, %v4952_v54  ;;  %3221 = vmatmul.msk.f32.gmra.mxu0 %vm1596_vm1, %v2151_v16 }
 0x350   : > { %3213 = vmatmul.msk.f32.gmra.mxu3 %vm1596_vm1, %v4845_v61  ;;  %2513 = vmatpush.msra.mxu0 %v3401_v37  ;;  %v2153_v63 = vpop.trf.xlu1  ;;  %v2265_v61 = vpop.trf.xlu0 }
 0x351   : > { %2829 = vmatpush.msrb.mxu2 %v4623_v57  ;;  %v2380_v57 = vpop.permute.xlu2 %2379 }
 0x352   : > { %2514 = vmatpush.msra.mxu0 %v5148_v21 }
 0x354   : > { %2515 = vmatpush.msra.mxu0 %v5149_v9 }
 0x355   : > { %3233 = vmatmul.msk.f32.gmra.mxu1 %vm1596_vm1, %v2264_v5 }
 0x356   : > { %2516 = vmatpush.msra.mxu0 %v5150_v62 }
 0x357   : > { %3222 = vmatmul.msk.f32.gmra.mxu0 %vm1596_vm1, %v2152_v58 }
 0x358   : > { %2664 = vmatpush.msrb.mxu0 %v4802_v19  ;;  %3214 = vmatmul.msk.f32.gmra.mxu3 %vm1596_vm1, %v4847_v47  ;;  %v2154_v6 = vpop.trf.xlu1  ;;  %v2266_v49 = vpop.trf.xlu0 }
 0x359   : > { %v4984_v47 = vpop.permute.xlu2 %2399 }
 0x35a   : > { %2665 = vmatpush.msrb.mxu0 %v4785_v44 }
 0x35d   : > { %3234 = vmatmul.msk.f32.gmra.mxu1 %vm1596_vm1, %v2265_v61 }
 0x35f   : > { %3223 = vmatmul.msk.f32.gmra.mxu0 %vm1596_vm1, %v2153_v63 }
 0x360   : > { %3215 = vmatmul.msk.f32.gmra.mxu3 %vm1596_vm1, %v4849_v40  ;;  %v2155_v13 = vpop.trf.xlu1  ;;  %v2267_v52 = vpop.trf.xlu0 }
 0x361   : > { %v2390_v40 = vpop.permute.xlu2 %2389 }
 0x365   : > { %3235 = vmatmul.msk.f32.gmra.mxu1 %vm1596_vm1, %v2266_v49 }
 0x367   : > { %3224 = vmatmul.msk.f32.gmra.mxu0 %vm1596_vm1, %v2154_v6 }
 0x368   : > { %3216 = vmatmul.msk.f32.gmra.mxu3 %vm1596_vm1, %v4851_v1  ;;  %v2156_v17 = vpop.trf.xlu1  ;;  %v2268_v53 = vpop.trf.xlu0 }
 0x369   : > { %v2628_v1 = vpop.trf.xlu2 }
 0x36d   : > { %3236 = vmatmul.msk.f32.gmra.mxu1 %vm1596_vm1, %v2267_v52 }
 0x36f   : > { %3225 = vmatmul.msk.f32.gmra.mxu0 %vm1596_vm1, %v2155_v13 }
 0x370   : > { %3217 = vmatmul.msk.f32.gmra.mxu3 %vm1596_vm1, %v4853_v39  ;;  %v2157_v55 = vpop.trf.xlu1  ;;  %v2395_v28 = vpop.permute.xlu0 %2394 }
 0x371   : > { %v2629_v39 = vpop.trf.xlu2 }
 0x375   : > { %3237 = vmatmul.msk.f32.gmra.mxu1 %vm1596_vm1, %v2268_v53 }
 0x377   : > { %3226 = vmatmul.msk.f32.gmra.mxu0 %vm1596_vm1, %v2156_v17 }
 0x378   : > { %2494 = vmatmul.f32.vlgmr.msrb.gmra.mxu3 %v4785_v44  ;;  %v5151_v44 = vld [vmem:[#allocation11_spill] sm:$0xff]  ;;  %v2385_v2 = vpop.permute.xlu1 %2384  ;;  %v2415_v58 = vpop.permute.xlu0 %2414 }
 0x37d   : > { %3244 = vmatmul.msk.f32.vlgmr.msra.gmra.mxu1 %vm1596_vm1, %v2628_v1 }
 0x37e   : > { %2907 = vmatpush.msra.mxu1 %v4370_v11 }
 0x37f   : > { %3227 = vmatmul.msk.f32.gmra.mxu0 %vm1596_vm1, %v2157_v55 }
 0x380   : > { %2497 = vmatmul.f32.gmra.mxu3 %v4802_v19  ;;  %2908 = vmatpush.msra.mxu1 %v4383_v43  ;;  %v5153_v19 = vld [vmem:[#allocation13_spill] sm:$0xff]  ;;  %v2405_v61 = vpop.permute.xlu0 %2404 }
 0x385   : > { %3245 = vmatmul.msk.f32.gmra.mxu1 %vm1596_vm1, %v2629_v39 }
 0x387   : > { %2517 = vmatmul.f32.vlgmr.msra.gmra.mxu0 %v4746_v29 }
 0x388   : > { %2772 = vmatpush.msra.mxu0 %v5151_v44  ;;  %v2410_v53 = vpop.permute.xlu0 %2409 }
 0x38a   : > { %2773 = vmatpush.msra.mxu0 %v5152_v25 }
 0x38f   : > { %2520 = vmatmul.f32.gmra.mxu0 %v4759_v51 }
 0x397   : > { %3242 = vmatmul.msk.f32.vlgmr.msrb.gmra.mxu0 %vm1596_vm1, %v2628_v1 }
 0x398   : > { %2884 = vmatpush.msrb.mxu0 %v4365_v20 }
 0x39a   : > { %2885 = vmatpush.msrb.mxu0 %v5153_v19 }
 0x39f   : > { %3243 = vmatmul.msk.f32.gmra.mxu0 %vm1596_vm1, %v2629_v39 }
 0x3aa   : > { %v2102_v11 = vpop.f32.mrf.mxu3  ;;  %v2322_v43 = vpop.f32.mrf.mxu1 }
 0x3b2   : > { %v2105_v59 = vpop.f32.mrf.mxu3  ;;  %v2325_v36 = vpop.f32.mrf.mxu1 }
 0x3b4   : > { %v2211_v29 = vpop.f32.mrf.mxu0 }
 0x3b5   : > { %v2212_v8 = vadd.f32 %v2211_v29, %v2102_v11 }
 0x3b7   : > { %v2352_v22 = vadd.f32 %v2322_v43, %v2212_v8  ;;  %v2420_v8 = vpop.permute.xlu1 %2419 }
 0x3b9   : > { %v5007_v56 = vadd.f32 %v2375_v45, %v2352_v22 }
 0x3ba   : > { %v2328_v3 = vpop.f32.mrf.mxu1 }
 0x3bb   : > { %v2108_v30 = vpop.f32.mrf.mxu3  ;;  %3246 = vmatmul.msk.f32.vlgmr.msra.gmra.mxu2 %vm1596_vm1, %v5007_v56 }
 0x3bc   : > { %v2214_v51 = vpop.f32.mrf.mxu0  ;;  %2940 = vmatpush.msra.mxu2 %v4650_v26  ;;  %v2980_v26 = vld [vmem:[%s5099_s18] sm:$0xff] }
 0x3bd   : > { %v2215_v20 = vadd.f32 %v2214_v51, %v2105_v59  ;;  %2994 = vxpose.xlu1.b32.start [1/2] (short) (narrow) %v2980_v26, 16 }
 0x3be   : > { %2941 = vmatpush.msra.mxu2 %v4664_v27 }
 0x3bf   : > { %v2353_v31 = vadd.f32 %v2325_v36, %v2215_v20 }
 0x3c1   : > { %v5013_v34 = vadd.f32 %v2380_v57, %v2353_v31 }
 0x3c2   : > { %v2331_v7 = vpop.f32.mrf.mxu1 }
 0x3c3   : > { %v2111_v35 = vpop.f32.mrf.mxu3  ;;  %3247 = vmatmul.msk.f32.gmra.mxu2 %vm1596_vm1, %v5013_v34 }
 0x3c4   : > { %v2217_v0 = vpop.f32.mrf.mxu0 }
 0x3c5   : > { %v2218_v10 = vadd.f32 %v2217_v0, %v2108_v30  ;;  %2995 = vxpose.xlu1.b32.end [2/2] (short) (narrow) %v2981_v18, 16  ;;  %v3403_v0 = vld [vmem:[%s5086_s5 + $0x8] sm:$0xff] }
 0x3c7   : > { %v2354_v33 = vadd.f32 %v2328_v3, %v2218_v10  ;;  %v3404_v10 = vld [vmem:[%s5086_s5 + $0x58] sm:$0xff] }
 0x3c9   : > { %v2424_v32 = vadd.f32 %v2385_v2, %v2354_v33  ;;  %v3407_v33 = vld [vmem:[%s5086_s5 + $0x88] sm:$0xff] }
 0x3ca   : > { %v2334_v16 = vpop.f32.mrf.mxu1 }
 0x3cb   : > { %v2114_v4 = vpop.f32.mrf.mxu3  ;;  %3250 = vmatmul.msk.f32.vlgmr.msra.gmra.mxu0 %vm1596_vm1, %v2424_v32  ;;  %3252 = vmatmul.msk.f32.vlgmr.msrb.gmra.mxu1 %vm1596_vm1, %v2424_v32 }
 0x3cc   : > { %v2220_v27 = vpop.f32.mrf.mxu0 }
 0x3cd   : > { %v2221_v41 = vadd.f32 %v2220_v27, %v2111_v35  ;;  %v3402_v35 = vld [vmem:[%s5086_s5 + $0x18] sm:$0xff] }
 0x3cf   : > { %v2355_v14 = vadd.f32 %v2331_v7, %v2221_v41  ;;  %v3405_v7 = vld [vmem:[%s5086_s5 + $0x48] sm:$0xff] }
 0x3d1   : > { %v2425_v12 = vadd.f32 %v2390_v40, %v2355_v14 }
 0x3d2   : > { %v2337_v42 = vpop.f32.mrf.mxu1 }
 0x3d3   : > { %v2117_v23 = vpop.f32.mrf.mxu3  ;;  %3251 = vmatmul.msk.f32.gmra.mxu0 %vm1596_vm1, %v2425_v12  ;;  %3253 = vmatmul.msk.f32.gmra.mxu1 %vm1596_vm1, %v2425_v12 }
 0x3d4   : > { %v2223_v38 = vpop.f32.mrf.mxu0 }
 0x3d5   : > { %v2224_v15 = vadd.f32 %v2223_v38, %v2114_v4 }
 0x3d7   : > { %v2356_v46 = vadd.f32 %v2334_v16, %v2224_v15 }
 0x3d9   : > { %v5027_v48 = vadd.f32 %v2395_v28, %v2356_v46 }
 0x3da   : > { %v2340_v37 = vpop.f32.mrf.mxu1 }
 0x3db   : > { %v2120_v24 = vpop.f32.mrf.mxu3  ;;  %3254 = vmatmul.msk.f32.vlgmr.msrb.gmra.mxu2 %vm1596_vm1, %v5027_v48 }
 0x3dc   : > { %v2226_v50 = vpop.f32.mrf.mxu0 }
 0x3dd   : > { %v2227_v5 = vadd.f32 %v2226_v50, %v2117_v23 }
 0x3df   : > { %v2357_v21 = vadd.f32 %v2337_v42, %v2227_v5 }
 0x3e1   : > { %v2427_v9 = vadd.f32 %v4984_v47, %v2357_v21 }
 0x3e2   : > { %v2343_v6 = vpop.f32.mrf.mxu1 }
 0x3e3   : > { %3255 = vmatmul.msk.f32.gmra.mxu2 %vm1596_vm1, %v2427_v9  ;;  %v2123_v62 = vpop.f32.mrf.mxu3 }
 0x3e4   : > { %v2229_v45 = vpop.f32.mrf.mxu0 }
 0x3e5   : > { %v2230_v63 = vadd.f32 %v2229_v45, %v2120_v24 }
 0x3e7   : > { %v2358_v57 = vadd.f32 %v2340_v37, %v2230_v63 }
 0x3e9   : > { %v2428_v49 = vadd.f32 %v2405_v61, %v2358_v57 }
 0x3ea   : > { %v2346_v47 = vpop.f32.mrf.mxu1 }
 0x3eb   : > { %3258 = vmatmul.msk.f32.vlgmr.msrb.gmra.mxu0 %vm1596_vm1, %v2428_v49  ;;  %3260 = vmatmul.msk.f32.vlgmr.msra.gmra.mxu1 %vm1596_vm1, %v2428_v49  ;;  %v2126_v40 = vpop.f32.mrf.mxu3 }
 0x3ec   : > { %v2232_v13 = vpop.f32.mrf.mxu0 }
 0x3ed   : > { %v2233_v52 = vadd.f32 %v2232_v13, %v2123_v62 }
 0x3ef   : > { %v2359_v17 = vadd.f32 %v2343_v6, %v2233_v52 }
 0x3f1   : > { %v2429_v1 = vadd.f32 %v2410_v53, %v2359_v17 }
 0x3f2   : > { %v2349_v43 = vpop.f32.mrf.mxu1 }
 0x3f3   : > { %3259 = vmatmul.msk.f32.gmra.mxu0 %vm1596_vm1, %v2429_v1  ;;  %3261 = vmatmul.msk.f32.gmra.mxu1 %vm1596_vm1, %v2429_v1  ;;  %v2129_v25 = vpop.f32.mrf.mxu3 }
 0x3f4   : > { %v2235_v55 = vpop.f32.mrf.mxu0 }
 0x3f5   : > { %v2236_v39 = vadd.f32 %v2235_v55, %v2126_v40 }
 0x3f7   : > { %v2360_v44 = vadd.f32 %v2346_v47, %v2236_v39 }
 0x3f9   : > { %v2430_v19 = vadd.f32 %v2415_v58, %v2360_v44 }
 0x3fa   : > { %v2690_v57 = vpop.f32.mrf.mxu1 }
 0x3fb   : > { %3262 = vmatmul.msk.f32.vlgmr.msra.gmra.mxu2 %vm1596_vm1, %v2430_v19  ;;  %v2495_v22 = vpop.f32.mrf.mxu3 }
 0x3fc   : > { %v2238_v11 = vpop.f32.mrf.mxu0 }
 0x3fd   : > { %v2239_v59 = vadd.f32 %v2238_v11, %v2129_v25 }
 0x3ff   : > { %v2361_v29 = vadd.f32 %v2349_v43, %v2239_v59 }
 0x401   : > { %v2431_v36 = vadd.f32 %v2420_v8, %v2361_v29 }
 0x402   : > { %v2693_v49 = vpop.f32.mrf.mxu1 }
 0x403   : > { %3263 = vmatmul.msk.f32.gmra.mxu2 %vm1596_vm1, %v2431_v36  ;;  %v2498_v51 = vpop.f32.mrf.mxu3 }
 0x404   : > { %v2518_v30 = vpop.f32.mrf.mxu0 }
 0x405   : > { %v2519_v31 = vadd.f32 %v2518_v30, %v2495_v22 }
 0x40c   : > { %v2521_v20 = vpop.f32.mrf.mxu0 }
 0x40d   : > { %v2522_v3 = vadd.f32 %v2521_v20, %v2498_v51 }
 0x40f   : > { %2603 = vmatpush.msra.mxu3 %v2522_v3 }
 0x411   : > { %2604 = vmatpush.msra.mxu3 %v2519_v31 }
 0x412   : > { %3240 = vmatmul.msk.f32.vlgmr.msra.gmra.mxu3 %vm1596_vm1, %v4921_v60  ;;  %v3406_v60 = vld [vmem:[%s5086_s5 + $0x98] sm:$0xff] }
 0x413   : > { %2739 = vmatpush.msrb.mxu3 %v3402_v35  ;;  %v2987_v35 = vpop.permute.xlu2 %2986 }
 0x414   : > { %v2667_v2 = vpop.f32.mrf.mxu0 }
 0x415   : > { %2740 = vmatpush.msrb.mxu3 %v3403_v0 }
 0x417   : > { %2851 = vmatpush.msra.mxu3 %v3404_v10 }
 0x419   : > { %2852 = vmatpush.msra.mxu3 %v3405_v7  ;;  %v2992_v7 = vpop.permute.xlu0 %2991 }
 0x41a   : > { %3241 = vmatmul.msk.f32.gmra.mxu3 %vm1596_vm1, %v4952_v54  ;;  %v2583_v54 = vpop.f32.mrf.mxu2 }
 0x41b   : > { %v2668_v12 = vadd.f32 %v2667_v2, %v2583_v54 }
 0x41c   : > { %v2670_v26 = vpop.f32.mrf.mxu0 }
 0x422   : > { %3248 = vmatmul.msk.f32.vlgmr.msrb.gmra.mxu3 %vm1596_vm1, %v5007_v56  ;;  %v2586_v56 = vpop.f32.mrf.mxu2 }
 0x423   : > { %2963 = vmatpush.msrb.mxu3 %v3406_v60  ;;  %v2671_v18 = vadd.f32 %v2670_v26, %v2586_v56 }
 0x425   : > { %2964 = vmatpush.msrb.mxu3 %v3407_v33 }
 0x42a   : > { %3249 = vmatmul.msk.f32.gmra.mxu3 %vm1596_vm1, %v5013_v34 }
 0x432   : > { %3256 = vmatmul.msk.f32.vlgmr.msra.gmra.mxu3 %vm1596_vm1, %v5027_v48 }
 0x43a   : > { %3257 = vmatmul.msk.f32.gmra.mxu3 %vm1596_vm1, %v2427_v9 }
 0x43e   : > { %v2719_v32 = vpop.f32.mrf.mxu2 }
 0x43f   : > { %v2748_v28 = vadd.f32 %v2719_v32, %v2668_v12 }
 0x442   : > { %3264 = vmatmul.msk.f32.vlgmr.msrb.gmra.mxu3 %vm1596_vm1, %v2430_v19 }
 0x446   : > { %v2722_v4 = vpop.f32.mrf.mxu2 }
 0x447   : > { %v2750_v38 = vadd.f32 %v2722_v4, %v2671_v18 }
 0x448   : > { %v2775_v27 = vpop.f32.mrf.mxu0  ;;  %v2798_v40 = vpop.f32.mrf.mxu1 }
 0x449   : > { %v2804_v42 = vadd.f32 %v2775_v27, %v2748_v28 }
 0x44a   : > { %3265 = vmatmul.msk.f32.gmra.mxu3 %vm1596_vm1, %v2431_v36 }
 0x450   : > { %v2778_v16 = vpop.f32.mrf.mxu0  ;;  %v2801_v53 = vpop.f32.mrf.mxu1 }
 0x451   : > { %v2806_v15 = vadd.f32 %v2778_v16, %v2750_v38 }
 0x45e   : > { %v2831_v41 = vpop.f32.mrf.mxu2 }
 0x45f   : > { %v2860_v48 = vadd.f32 %v2831_v41, %v2804_v42 }
 0x461   : > { %v3010_v62 = vpop.trf.xlu1 }
 0x466   : > { %v2834_v14 = vpop.f32.mrf.mxu2 }
 0x467   : > { %v2862_v24 = vadd.f32 %v2834_v14, %v2806_v15 }
 0x468   : > { %v2887_v34 = vpop.f32.mrf.mxu0  ;;  %v2910_v39 = vpop.f32.mrf.mxu1 }
 0x469   : > { %v2916_v58 = vadd.f32 %v2887_v34, %v2860_v48  ;;  %v3011_v63 = vpop.trf.xlu1 }
 0x470   : > { %v2890_v46 = vpop.f32.mrf.mxu0  ;;  %v2913_v8 = vpop.f32.mrf.mxu1 }
 0x471   : > { %v2918_v50 = vadd.f32 %v2890_v46, %v2862_v24 }
 0x47e   : > { %v2943_v23 = vpop.f32.mrf.mxu2 }
 0x47f   : > { %v2972_v37 = vadd.f32 %v2943_v23, %v2916_v58 }
 0x481   : > { %v2976_v45 = vmax.f32 %v2972_v37, 0.0 }
 0x486   : > { %v2946_v5 = vpop.f32.mrf.mxu2 }
 0x487   : > { %v2974_v21 = vadd.f32 %v2946_v5, %v2918_v50 }
 0x489   : > { %v2978_v9 = vmax.f32 %v2974_v21, 0.0 }
 0x48b   : > { %3046 = vmatpush.msra.mxu0 %v2978_v9 }
 0x48d   : > { %3047 = vmatpush.msra.mxu0 %v2976_v45 }
 0x48e   : > { %3266 = vmatmul.msk.f32.vlgmr.msra.gmra.mxu0 %vm1596_vm1, %v3010_v62 }
 0x495   : > { %v2606_v61 = vpop.f32.mrf.mxu3 }
 0x496   : > { %3267 = vmatmul.msk.f32.gmra.mxu0 %vm1596_vm1, %v3011_v63  ;;  %v2691_v47 = vadd.f32 %v2690_v57, %v2606_v61 }
 0x49d   : > { %v2609_v6 = vpop.f32.mrf.mxu3 }
 0x49e   : > { %v2694_v55 = vadd.f32 %v2693_v49, %v2609_v6 }
 0x4a5   : > { %v2742_v13 = vpop.f32.mrf.mxu3 }
 0x4a6   : > { %v2749_v44 = vadd.f32 %v2742_v13, %v2691_v47 }
 0x4a8   : > { %v2805_v11 = vadd.f32 %v2798_v40, %v2749_v44 }
 0x4ad   : > { %v2745_v52 = vpop.f32.mrf.mxu3 }
 0x4ae   : > { %v2751_v25 = vadd.f32 %v2745_v52, %v2694_v55 }
 0x4b0   : > { %v2807_v43 = vadd.f32 %v2801_v53, %v2751_v25 }
 0x4b5   : > { %v2854_v17 = vpop.f32.mrf.mxu3 }
 0x4b6   : > { %v2861_v59 = vadd.f32 %v2854_v17, %v2805_v11 }
 0x4b8   : > { %v2917_v36 = vadd.f32 %v2910_v39, %v2861_v59 }
 0x4bd   : > { %v2857_v1 = vpop.f32.mrf.mxu3 }
 0x4be   : > { %v2863_v29 = vadd.f32 %v2857_v1, %v2807_v43 }
 0x4c0   : > { %v2919_v22 = vadd.f32 %v2913_v8, %v2863_v29 }
 0x4c5   : > { %v2966_v19 = vpop.f32.mrf.mxu3 }
 0x4c6   : > { %v2973_v51 = vadd.f32 %v2966_v19, %v2917_v36 }
 0x4c8   : > { %v2977_v31 = vmax.f32 %v2973_v51, 0.0 }
 0x4cd   : > { %v2969_v30 = vpop.f32.mrf.mxu3 }
 0x4ce   : > { %v2975_v20 = vadd.f32 %v2969_v30, %v2919_v22 }
 0x4d0   : > { %v2979_v3 = vmax.f32 %v2975_v20, 0.0 }
 0x4d2   : > { %3069 = vmatpush.msrb.mxu1 %v2979_v3 }
 0x4d4   : > { %3070 = vmatpush.msrb.mxu1 %v2977_v31 }
 0x4d5   : > { %3268 = vmatmul.msk.f32.vlgmr.msrb.gmra.mxu1 %vm1596_vm1, %v3010_v62 }
 0x4dd   : > { %3269 = vmatmul.msk.f32.gmra.mxu1 %vm1596_vm1, %v3011_v63 }
 0x50b   : > { %v3049_v0 = vpop.f32.mrf.mxu0 }
 0x50c   : > { %v3050_v10 = vadd.f32 %v3049_v0, %v2987_v35 }
 0x50e   : > { %3078 = vst [vmem:[%s631_s27] sm:$0xff] %v3050_v10 }
 0x513   : > { %v3052_v60 = vpop.f32.mrf.mxu0 }
 0x514   : > { %v3053_v33 = vadd.f32 %v3052_v60, %v2992_v7 }
 0x516   : > { %3080 = vst [vmem:[%s631_s27 + $0x10] sm:$0xff] %v3053_v33 }
 0x552   : > { %v3072_v54 = vpop.f32.mrf.mxu1 }
 0x553   : > { %v3073_v56 = vadd.f32 %v3072_v54, %v2987_v35 }
 0x555   : > { %3079 = vst [vmem:[%s631_s27 + $0x8] sm:$0xff] %v3073_v56 }
 0x55a   : > { %v3075_v2 = vpop.f32.mrf.mxu1 }
 0x55b   : > { %v3076_v32 = vadd.f32 %v3075_v2, %v2992_v7 }
 0x55d   : > { %3081 = vst [vmem:[%s631_s27 + $0x18] sm:$0xff] %v3076_v32 }
 0x55e PF: > { %s30_s1 = sadd.s32 1, %s3414_s1  }
 0x55f   : > { %p27_p5 = scmp.ge.s32.totalorder %s30_s1, 6  }
 0x561   :  { %29 = sbr.rel (!%p27_p5) target bundleno = 7 (0x7), region = 130 }

</bundles_post_ra>
